<compile_context>
chip_gen: v7x
topology: tpu7x:2x2x1
jax: 0.10.0
libtpu: 0.0.40
codegen_flags: <defaults>
</compile_context>

<pallas_src>
import functools
import math

import jax
import jax.numpy as jnp
from jax.experimental import pallas as pl
from jax.experimental.pallas import tpu as pltpu

# bf16 operands for all MXU matmuls (fp32 accumulation requested at every dot).
_MM_DTYPE = jnp.bfloat16


def _round_up(x: int, m: int) -> int:
    return ((x + m - 1) // m) * m


def _pick_hidden_tile(hm: int, target: int) -> int:
    """Largest hidden-dim tile <= target that divides Hm and is lane-aligned."""
    if hm <= target:
        return hm
    for t in range(min(target, hm), 0, -1):
        if hm % t == 0 and t % 128 == 0:
            return t
    return hm


@functools.lru_cache(maxsize=None)
def _vmem_limit_bytes() -> int:
    """Scoped-VMEM ceiling: <= 3/4 of physical, capped at 64 MiB.

    v5e/v6e (128 MiB physical) -> 64 MiB; v7x (64 MiB physical) -> 48 MiB.
    """
    try:
        info = pltpu.get_tpu_info()
        cap = getattr(info, "vmem_capacity_bytes", 0) or 0
        if cap > 0:
            return int(min(64 * 1024 * 1024, (cap * 3) // 4))
    except Exception:
        pass
    return 48 * 1024 * 1024


def _fs(shape):
    """Whole-array BlockSpec (weights / per-feature params, grid-invariant).

    TODO(synk): pipeline_mode=pl.Buffered(1) here once verified supported —
    these blocks never change across grid steps so double-buffering only
    doubles their VMEM footprint.
    """
    zeros = (0,) * len(shape)
    return pl.BlockSpec(shape, lambda *args, _z=zeros: _z)


# ----------------------------------------------------------------------------
# Kernel 1: LayerNorm (pre-attention) + fused QKV projection
#   grid = (B, Np // tn); every step independent -> both axes "parallel".
#   Q/K/V are written back in the lane-dense (B, N, F) layout (no head split
#   in HBM, no XLA transpose afterwards).
# ----------------------------------------------------------------------------
def _ln_qkv_kernel(x_ref,                 # (1, tn, F) f32
                   ln_g_ref, ln_b_ref,    # (1, F) f32
                   qkv_w_ref,             # (F, 3F) bf16
                   qkv_b_ref,             # (1, 3F) f32
                   q_ref, k_ref, v_ref,   # (1, tn, F) bf16 outputs
                   *, eps: float):
    x = x_ref[0]                          # (tn, F) fp32
    f = x.shape[-1]

    mu = jnp.mean(x, axis=-1, keepdims=True)
    var = jnp.mean(jnp.square(x - mu), axis=-1, keepdims=True)
    xn = (x - mu) * jax.lax.rsqrt(var + eps)
    xn = xn * ln_g_ref[0] + ln_b_ref[0]

    qkv = jnp.dot(xn.astype(_MM_DTYPE), qkv_w_ref[...],
                  preferred_element_type=jnp.float32)
    qkv = qkv + qkv_b_ref[0]              # (tn, 3F) fp32; columns = [Q | K | V]

    q_ref[0] = qkv[:, 0 * f:1 * f].astype(_MM_DTYPE)
    k_ref[0] = qkv[:, 1 * f:2 * f].astype(_MM_DTYPE)
    v_ref[0] = qkv[:, 2 * f:3 * f].astype(_MM_DTYPE)


# ----------------------------------------------------------------------------
# Kernel 2: attention + proj + LayerScale residual + LN2 + streamed MLP +
#           LayerScale residual.
#   grid = (B, Np // tn, Hm // hm_t); the last axis streams fc1/fc2 tiles and
#   accumulates into a VMEM scratch (classic init/accumulate/finalize).
#   Attention + LN2 only run at j == 0; their results persist in scratch.
# ----------------------------------------------------------------------------
def _attn_mlp_kernel(x_ref,                               # (1, tq, F) f32  (residual)
                     q_ref,                               # (1, tq, F) bf16
                     k_ref, v_ref,                        # (1, Np, F) bf16
                     proj_w_ref, proj_b_ref, gamma1_ref,  # (F, F) bf16, (1,F), (1,F)
                     ln2_g_ref, ln2_b_ref,                # (1, F)
                     fc1_w_ref, fc1_b_ref,                # (F, hm_t) bf16, (1, hm_t)
                     fc2_w_ref,                           # (hm_t, F) bf16
                     fc2_b_ref, gamma2_ref,               # (1, F)
                     out_ref,                             # (1, tq, F)
                     x1_scr,                              # (tq, F) f32 scratch
                     yn_scr,                              # (tq, F) bf16 scratch
                     acc_scr,                             # (tq, F) f32 scratch
                     *, num_heads: int, n_valid: int, eps: float,
                     approximate_gelu: bool):
    j = pl.program_id(2)
    n_mlp_steps = pl.num_programs(2)

    # ---------------- attention + residual + LN2 (only at j == 0) ------------
    @pl.when(j == 0)
    def _attention_and_ln2():
        x = x_ref[0]                                      # (tq, F) f32
        f = x.shape[-1]
        hd = f // num_heads
        n_keys = k_ref.shape[1]
        scale = 1.0 / math.sqrt(hd)

        # Mask padded key positions (static: only built when padding exists).
        if n_keys != n_valid:
            key_bias = jnp.where(
                jax.lax.broadcasted_iota(jnp.int32, (1, n_keys), 1) < n_valid,
                jnp.float32(0.0), jnp.float32(-1e30))
        else:
            key_bias = None

        # Heads are split with static lane slices of the VMEM tiles (no HBM
        # round trip, no 3-D relayout).  Each head: QK^T -> softmax -> PV.
        # TODO(synk): flash-style K/V tiling for very long N.
        o_heads = []
        for h in range(num_heads):
            lo, hi = h * hd, (h + 1) * hd
            qh = q_ref[0, :, lo:hi]                       # (tq, hd) bf16
            kh = k_ref[0, :, lo:hi]                       # (Np, hd) bf16
            vh = v_ref[0, :, lo:hi]                       # (Np, hd) bf16

            s = jax.lax.dot_general(                      # (tq, Np) f32
                qh, kh, (((1,), (1,)), ((), ())),
                preferred_element_type=jnp.float32) * scale
            if key_bias is not None:
                s = s + key_bias
            s = s - jnp.max(s, axis=-1, keepdims=True)
            p = jnp.exp(s)
            denom = jnp.sum(p, axis=-1, keepdims=True)
            p = p * pl.reciprocal(denom, approx=True)     # EUP, not VALU div

            o_heads.append(jnp.dot(p.astype(_MM_DTYPE), vh,
                                   preferred_element_type=jnp.float32))

        # Reassemble the (tq, F) context slab -> ONE full-K output projection.
        o = jnp.concatenate(o_heads, axis=-1)             # (tq, F) f32
        proj = jnp.dot(o.astype(_MM_DTYPE), proj_w_ref[...],
                       preferred_element_type=jnp.float32) + proj_b_ref[0]

        x1 = x + proj * gamma1_ref[0]                     # LayerScale + residual 1
        x1_scr[...] = x1

        # LayerNorm (pre-MLP); result persists across the hidden-dim sweep.
        mu = jnp.mean(x1, axis=-1, keepdims=True)
        var = jnp.mean(jnp.square(x1 - mu), axis=-1, keepdims=True)
        yn = (x1 - mu) * jax.lax.rsqrt(var + eps)
        yn_scr[...] = (yn * ln2_g_ref[0] + ln2_b_ref[0]).astype(_MM_DTYPE)

        acc_scr[...] = jnp.zeros_like(acc_scr)

    # ---------------- MLP hidden-dim tile (every j) ---------------------------
    h1 = jnp.dot(yn_scr[...], fc1_w_ref[...],
                 preferred_element_type=jnp.float32) + fc1_b_ref[0]
    h1 = jax.nn.gelu(h1, approximate=approximate_gelu)    # tanh path by default
    acc_scr[...] += jnp.dot(h1.astype(_MM_DTYPE), fc2_w_ref[...],
                            preferred_element_type=jnp.float32)

    # ---------------- finalize (last hidden tile) -----------------------------
    @pl.when(j == n_mlp_steps - 1)
    def _finalize():
        out = x1_scr[...] + (acc_scr[...] + fc2_b_ref[0]) * gamma2_ref[0]
        out_ref[0] = out.astype(out_ref.dtype)


# ----------------------------------------------------------------------------
# One transformer block = two pallas_calls (tokens already padded to tile)
# ----------------------------------------------------------------------------
def _block_padded(x, params, num_heads, *, n_valid, tn, mlp_tile,
                  approximate_gelu, eps):
    B, Np, F = x.shape
    assert F % num_heads == 0, "features_per_token must divide num_heads"
    assert Np % tn == 0
    Hm = params["fc1_w"].shape[1]
    hm_t = _pick_hidden_tile(Hm, mlp_tile)
    n_tok_tiles = Np // tn
    n_mlp_tiles = Hm // hm_t
    vmem_limit = _vmem_limit_bytes()

    # No-op casts when prepare_block_params() has already been applied.
    qkv_w = params["qkv_w"].astype(_MM_DTYPE)
    proj_w = params["proj_w"].astype(_MM_DTYPE)
    fc1_w = params["fc1_w"].astype(_MM_DTYPE)
    fc2_w = params["fc2_w"].astype(_MM_DTYPE)

    # ---- kernel 1: LN1 + QKV ----
    q, k, v = pl.pallas_call(
        functools.partial(_ln_qkv_kernel, eps=eps),
        out_shape=tuple(jax.ShapeDtypeStruct((B, Np, F), _MM_DTYPE)
                        for _ in range(3)),
        grid_spec=pltpu.PrefetchScalarGridSpec(
            num_scalar_prefetch=0,
            grid=(B, n_tok_tiles),
            in_specs=[
                pl.BlockSpec((1, tn, F), lambda b, t: (b, t, 0)),   # tokens tile
                _fs((1, F)), _fs((1, F)),                           # ln1 g, b
                _fs((F, 3 * F)), _fs((1, 3 * F)),                   # qkv w, b
            ],
            out_specs=[
                pl.BlockSpec((1, tn, F), lambda b, t: (b, t, 0)),
                pl.BlockSpec((1, tn, F), lambda b, t: (b, t, 0)),
                pl.BlockSpec((1, tn, F), lambda b, t: (b, t, 0)),
            ],
        ),
        compiler_params=pltpu.CompilerParams(
            dimension_semantics=("parallel", "parallel"),
            vmem_limit_bytes=vmem_limit),
    )(x, params["ln1_g"], params["ln1_b"], qkv_w, params["qkv_b"])

    # ---- kernel 2: attention + proj + residual + LN2 + streamed MLP ----
    out = pl.pallas_call(
        functools.partial(_attn_mlp_kernel, num_heads=num_heads,
                          n_valid=n_valid, eps=eps,
                          approximate_gelu=approximate_gelu),
        out_shape=jax.ShapeDtypeStruct((B, Np, F), x.dtype),
        grid_spec=pltpu.PrefetchScalarGridSpec(
            num_scalar_prefetch=0,
            grid=(B, n_tok_tiles, n_mlp_tiles),
            in_specs=[
                pl.BlockSpec((1, tn, F), lambda b, t, j: (b, t, 0)),   # x residual
                pl.BlockSpec((1, tn, F), lambda b, t, j: (b, t, 0)),   # Q tile
                pl.BlockSpec((1, Np, F), lambda b, t, j: (b, 0, 0)),   # K full
                pl.BlockSpec((1, Np, F), lambda b, t, j: (b, 0, 0)),   # V full
                _fs((F, F)), _fs((1, F)), _fs((1, F)),                 # proj w,b + gamma1
                _fs((1, F)), _fs((1, F)),                              # ln2 g, b
                pl.BlockSpec((F, hm_t), lambda b, t, j: (0, j)),       # fc1 w tile
                pl.BlockSpec((1, hm_t), lambda b, t, j: (0, j)),       # fc1 b tile
                pl.BlockSpec((hm_t, F), lambda b, t, j: (j, 0)),       # fc2 w tile
                _fs((1, F)),                                           # fc2 b
                _fs((1, F)),                                           # gamma2
            ],
            out_specs=pl.BlockSpec((1, tn, F), lambda b, t, j: (b, t, 0)),
            scratch_shapes=[
                pltpu.VMEM((tn, F), jnp.float32),    # x1 (post-attention residual)
                pltpu.VMEM((tn, F), _MM_DTYPE),      # LN2 output (matmul operand)
                pltpu.VMEM((tn, F), jnp.float32),    # MLP f32 accumulator
            ],
        ),
        compiler_params=pltpu.CompilerParams(
            dimension_semantics=("parallel", "parallel", "arbitrary"),
            vmem_limit_bytes=vmem_limit),
    )(x, q, k, v,
      proj_w, params["proj_b"], params["gamma1"],
      params["ln2_g"], params["ln2_b"],
      fc1_w, params["fc1_b"], fc2_w, params["fc2_b"], params["gamma2"])

    return out


# ----------------------------------------------------------------------------
# Public entry points
# ----------------------------------------------------------------------------
def transformer_stage(tokens, block_params_list, *, num_heads, q_tile=128,
                      mlp_tile=512, approximate_gelu=True, eps=1e-6):
    """Sequentially apply every block, exactly like the nn.ModuleList loop.

    Tokens are padded ONCE to a multiple of the token tile (padded keys are
    masked in the softmax), all blocks run on the padded stream, and the
    result is sliced back to the original N at the end.
    """
    assert q_tile % 8 == 0 and q_tile > 0
    B, N, F = tokens.shape

    tn = min(q_tile, _round_up(N, 8))
    n_pad = _round_up(N, tn)
    x = tokens
    if n_pad != N:
        x = jnp.pad(tokens, ((0, 0), (0, n_pad - N), (0, 0)))

    # TODO(synk): cross-pallas_call weight prefetch (P10) across this loop.
    for params in block_params_list:
        x = _block_padded(x, params, num_heads, n_valid=N, tn=tn,
                          mlp_tile=mlp_tile,
                          approximate_gelu=approximate_gelu, eps=eps)

    if n_pad != N:
        x = x[:, :N, :]
    return x


def transformer_block(tokens, params, num_heads, **kwargs):
    """Single-block convenience wrapper."""
    return transformer_stage(tokens, [params], num_heads=num_heads, **kwargs)


# ----------------------------------------------------------------------------
# Parameter construction / preparation (synthetic, not a checkpoint)
# ----------------------------------------------------------------------------
def make_block_params(key, features_per_token, hidden_ratio=4):
    F = features_per_token
    H = hidden_ratio * F
    ks = jax.random.split(key, 8)
    std = 0.02
    return {
        "ln1_g": jnp.ones((1, F), jnp.float32),
        "ln1_b": jnp.zeros((1, F), jnp.float32),
        "qkv_w": std * jax.random.normal(ks[0], (F, 3 * F), jnp.float32),
        "qkv_b": std * jax.random.normal(ks[1], (1, 3 * F), jnp.float32),
        "proj_w": std * jax.random.normal(ks[2], (F, F), jnp.float32),
        "proj_b": std * jax.random.normal(ks[3], (1, F), jnp.float32),
        "gamma1": jnp.full((1, F), 1e-1, jnp.float32),   # LayerScale
        "ln2_g": jnp.ones((1, F), jnp.float32),
        "ln2_b": jnp.zeros((1, F), jnp.float32),
        "fc1_w": std * jax.random.normal(ks[4], (F, H), jnp.float32),
        "fc1_b": std * jax.random.normal(ks[5], (1, H), jnp.float32),
        "fc2_w": std * jax.random.normal(ks[6], (H, F), jnp.float32),
        "fc2_b": std * jax.random.normal(ks[7], (1, F), jnp.float32),
        "gamma2": jnp.full((1, F), 1e-1, jnp.float32),   # LayerScale
    }


def prepare_block_params(params):
    """One-time bf16 pre-cast of the big matmul weights (done eagerly, once)."""
    out = dict(params)
    for name in ("qkv_w", "proj_w", "fc1_w", "fc2_w"):
        out[name] = params[name].astype(_MM_DTYPE)
    return out


# ----------------------------------------------------------------------------
# Pure-JAX fp32 reference for sanity checking
# ----------------------------------------------------------------------------
def _ref_block(x, p, num_heads, eps=1e-6, approximate=True):
    B, N, F = x.shape
    hd = F // num_heads

    def ln(z, g, b):
        mu = jnp.mean(z, -1, keepdims=True)
        var = jnp.mean((z - mu) ** 2, -1, keepdims=True)
        return (z - mu) / jnp.sqrt(var + eps) * g + b

    xn = ln(x, p["ln1_g"][0], p["ln1_b"][0])
    qkv = xn @ p["qkv_w"] + p["qkv_b"][0]
    q, k, v = jnp.split(qkv, 3, axis=-1)
    q = q.reshape(B, N, num_heads, hd).transpose(0, 2, 1, 3)
    k = k.reshape(B, N, num_heads, hd).transpose(0, 2, 1, 3)
    v = v.reshape(B, N, num_heads, hd).transpose(0, 2, 1, 3)
    s = jnp.einsum("bhqd,bhkd->bhqk", q, k) / math.sqrt(hd)
    a = jax.nn.softmax(s, axis=-1)
    o = jnp.einsum("bhqk,bhkd->bhqd", a, v).transpose(0, 2, 1, 3).reshape(B, N, F)
    o = (o @ p["proj_w"] + p["proj_b"][0]) * p["gamma1"][0]
    x = x + o
    yn = ln(x, p["ln2_g"][0], p["ln2_b"][0])
    h = jax.nn.gelu(yn @ p["fc1_w"] + p["fc1_b"][0], approximate=approximate)
    h = (h @ p["fc2_w"] + p["fc2_b"][0]) * p["gamma2"][0]
    return x + h


if __name__ == "__main__":
    key = jax.random.PRNGKey(0)

    # ------------------------------------------------------------------
    # Test 1: small stage (3 blocks), tile == full N, single MLP tile.
    # ------------------------------------------------------------------
    B, N, F, H, num_blocks = 2, 8, 32, 4, 3
    key, tkey = jax.random.split(key)
    tokens = jax.random.normal(tkey, (B, N, F), jnp.float32)
    bkeys = jax.random.split(key, num_blocks)
    params_f32 = [make_block_params(k, F) for k in bkeys]
    params = [prepare_block_params(p) for p in params_f32]   # one-time bf16 cast

    run = jax.jit(functools.partial(transformer_stage, num_heads=H))
    out = jax.block_until_ready(run(tokens, params))
    assert out.shape == (B, N, F)

    ref = tokens
    for p in params_f32:
        ref = _ref_block(ref, p, H)
    err = float(jnp.max(jnp.abs(out - ref)))
    assert err < 5e-2, f"test1 mismatch vs reference: {err}"

    # ------------------------------------------------------------------
    # Test 2: exercises token padding + key masking (N=10, tn=8 -> Np=16)
    #         and MLP hidden-dim streaming (Hm=256, mlp_tile=128 -> 2 steps).
    # ------------------------------------------------------------------
    B2, N2, F2, H2 = 1, 10, 64, 4
    key, tkey2, pkey2 = jax.random.split(key, 3)
    tokens2 = jax.random.normal(tkey2, (B2, N2, F2), jnp.float32)
    p2_f32 = make_block_params(pkey2, F2)          # Hm = 256
    p2 = prepare_block_params(p2_f32)

    run2 = jax.jit(functools.partial(transformer_stage, num_heads=H2,
                                     q_tile=8, mlp_tile=128))
    out2 = jax.block_until_ready(run2(tokens2, [p2]))
    assert out2.shape == (B2, N2, F2)

    ref2 = _ref_block(tokens2, p2_f32, H2)
    err2 = float(jnp.max(jnp.abs(out2 - ref2)))
    assert err2 < 5e-2, f"test2 mismatch vs reference: {err2}"

    print("KERNEL_OK")
</pallas_src>

<mosaic_0001>
module attributes {stable_mosaic.version = 11 : i64} {
  func.func @_ln_qkv_kernel(%arg0: i32, %arg1: i32, %arg2: memref<1x8x32xf32, #tpu.memory_space<vmem>>, %arg3: memref<1x32xf32, #tpu.memory_space<vmem>>, %arg4: memref<1x32xf32, #tpu.memory_space<vmem>>, %arg5: memref<32x96xbf16, #tpu.memory_space<vmem>>, %arg6: memref<1x96xf32, #tpu.memory_space<vmem>>, %arg7: memref<1x8x32xbf16, #tpu.memory_space<vmem>>, %arg8: memref<1x8x32xbf16, #tpu.memory_space<vmem>>, %arg9: memref<1x8x32xbf16, #tpu.memory_space<vmem>>) attributes {dimension_semantics = [#tpu.dimension_semantics<parallel>, #tpu.dimension_semantics<parallel>], iteration_bounds = array<i64: 2, 1>, scalar_prefetch = 0 : i64, scratch_operands = 0 : i64, tpu.core_type = #tpu.core_type<tc>, window_params = [{transform_indices = @transform_0, window_bounds = array<i64: 1, 8, 32>}, {pipeline_mode = #tpu.pipeline_mode<synchronous>, transform_indices = @transform_1, window_bounds = array<i64: 1, 32>}, {pipeline_mode = #tpu.pipeline_mode<synchronous>, transform_indices = @transform_2, window_bounds = array<i64: 1, 32>}, {pipeline_mode = #tpu.pipeline_mode<synchronous>, transform_indices = @transform_3, window_bounds = array<i64: 32, 96>}, {pipeline_mode = #tpu.pipeline_mode<synchronous>, transform_indices = @transform_4, window_bounds = array<i64: 1, 96>}, {transform_indices = @transform_5, window_bounds = array<i64: 1, 8, 32>}, {transform_indices = @transform_6, window_bounds = array<i64: 1, 8, 32>}, {transform_indices = @transform_7, window_bounds = array<i64: 1, 8, 32>}]} {
    %c0 = arith.constant 0 : index
    %c0_0 = arith.constant 0 : index
    %c0_1 = arith.constant 0 : index
    %0 = vector.load %arg2[%c0, %c0_0, %c0_1] : memref<1x8x32xf32, #tpu.memory_space<vmem>>, vector<1x8x32xf32>
    %1 = vector.shape_cast %0 : vector<1x8x32xf32> to vector<8x32xf32>
    %cst = arith.constant dense<0.000000e+00> : vector<8xf32>
    %2 = vector.multi_reduction <add>, %1, %cst [1] : vector<8x32xf32> to vector<8xf32>
    %3 = vector.shape_cast %2 : vector<8xf32> to vector<8x1xf32>
    %cst_2 = arith.constant 3.200000e+01 : f32
    %4 = vector.broadcast %cst_2 : f32 to vector<8x1xf32>
    %5 = arith.divf %3, %4 : vector<8x1xf32>
    %6 = vector.broadcast %5 : vector<8x1xf32> to vector<8x32xf32>
    %7 = arith.subf %1, %6 : vector<8x32xf32>
    %8 = arith.mulf %7, %7 : vector<8x32xf32>
    %cst_3 = arith.constant dense<0.000000e+00> : vector<8xf32>
    %9 = vector.multi_reduction <add>, %8, %cst_3 [1] : vector<8x32xf32> to vector<8xf32>
    %10 = vector.shape_cast %9 : vector<8xf32> to vector<8x1xf32>
    %cst_4 = arith.constant 3.200000e+01 : f32
    %11 = vector.broadcast %cst_4 : f32 to vector<8x1xf32>
    %12 = arith.divf %10, %11 : vector<8x1xf32>
    %13 = vector.broadcast %5 : vector<8x1xf32> to vector<8x32xf32>
    %14 = arith.subf %1, %13 : vector<8x32xf32>
    %cst_5 = arith.constant 9.99999997E-7 : f32
    %15 = vector.broadcast %cst_5 : f32 to vector<8x1xf32>
    %16 = arith.addf %12, %15 : vector<8x1xf32>
    %17 = math.rsqrt %16 : vector<8x1xf32>
    %18 = vector.broadcast %17 : vector<8x1xf32> to vector<8x32xf32>
    %19 = arith.mulf %14, %18 : vector<8x32xf32>
    %c0_6 = arith.constant 0 : index
    %c0_7 = arith.constant 0 : index
    %20 = vector.load %arg3[%c0_6, %c0_7] : memref<1x32xf32, #tpu.memory_space<vmem>>, vector<1x32xf32>
    %21 = vector.shape_cast %20 : vector<1x32xf32> to vector<32xf32>
    %22 = vector.shape_cast %21 : vector<32xf32> to vector<1x32xf32>
    %23 = vector.broadcast %22 : vector<1x32xf32> to vector<8x32xf32>
    %24 = arith.mulf %19, %23 : vector<8x32xf32>
    %c0_8 = arith.constant 0 : index
    %c0_9 = arith.constant 0 : index
    %25 = vector.load %arg4[%c0_8, %c0_9] : memref<1x32xf32, #tpu.memory_space<vmem>>, vector<1x32xf32>
    %26 = vector.shape_cast %25 : vector<1x32xf32> to vector<32xf32>
    %27 = vector.shape_cast %26 : vector<32xf32> to vector<1x32xf32>
    %28 = vector.broadcast %27 : vector<1x32xf32> to vector<8x32xf32>
    %29 = arith.addf %24, %28 : vector<8x32xf32>
    %30 = arith.truncf %29 : vector<8x32xf32> to vector<8x32xbf16>
    %c0_10 = arith.constant 0 : index
    %c0_11 = arith.constant 0 : index
    %31 = vector.load %arg5[%c0_10, %c0_11] : memref<32x96xbf16, #tpu.memory_space<vmem>>, vector<32x96xbf16>
    %cst_12 = arith.constant dense<0.000000e+00> : vector<8x96xf32>
    %32 = tpu.matmul %30, %31, %cst_12 {dimension_numbers = #tpu.dot_dimension_numbers<[1], [0], [0], [1], [0, 0, 1, 1], [], []>} : vector<8x32xbf16>, vector<32x96xbf16>, vector<8x96xf32> -> vector<8x96xf32>
    %c0_13 = arith.constant 0 : index
    %c0_14 = arith.constant 0 : index
    %33 = vector.load %arg6[%c0_13, %c0_14] : memref<1x96xf32, #tpu.memory_space<vmem>>, vector<1x96xf32>
    %34 = vector.shape_cast %33 : vector<1x96xf32> to vector<96xf32>
    %35 = vector.shape_cast %34 : vector<96xf32> to vector<1x96xf32>
    %36 = vector.broadcast %35 : vector<1x96xf32> to vector<8x96xf32>
    %37 = arith.addf %32, %36 : vector<8x96xf32>
    %38 = vector.extract_strided_slice %37 {offsets = [0, 0], sizes = [8, 32], strides = [1, 1]} : vector<8x96xf32> to vector<8x32xf32>
    %39 = arith.truncf %38 : vector<8x32xf32> to vector<8x32xbf16>
    %c0_15 = arith.constant 0 : index
    %c0_16 = arith.constant 0 : index
    %c0_17 = arith.constant 0 : index
    %40 = vector.load %arg7[%c0_15, %c0_16, %c0_17] : memref<1x8x32xbf16, #tpu.memory_space<vmem>>, vector<1x8x32xbf16>
    %41 = vector.shape_cast %40 : vector<1x8x32xbf16> to vector<8x32xbf16>
    %42 = vector.shape_cast %39 : vector<8x32xbf16> to vector<1x8x32xbf16>
    tpu.vector_store %arg7[%c0_15, %c0_16, %c0_17], %42 {strides = array<i32>} : memref<1x8x32xbf16, #tpu.memory_space<vmem>>, vector<1x8x32xbf16>,
    %43 = vector.extract_strided_slice %37 {offsets = [0, 32], sizes = [8, 32], strides = [1, 1]} : vector<8x96xf32> to vector<8x32xf32>
    %44 = arith.truncf %43 : vector<8x32xf32> to vector<8x32xbf16>
    %c0_18 = arith.constant 0 : index
    %c0_19 = arith.constant 0 : index
    %c0_20 = arith.constant 0 : index
    %45 = vector.load %arg8[%c0_18, %c0_19, %c0_20] : memref<1x8x32xbf16, #tpu.memory_space<vmem>>, vector<1x8x32xbf16>
    %46 = vector.shape_cast %45 : vector<1x8x32xbf16> to vector<8x32xbf16>
    %47 = vector.shape_cast %44 : vector<8x32xbf16> to vector<1x8x32xbf16>
    tpu.vector_store %arg8[%c0_18, %c0_19, %c0_20], %47 {strides = array<i32>} : memref<1x8x32xbf16, #tpu.memory_space<vmem>>, vector<1x8x32xbf16>,
    %48 = vector.extract_strided_slice %37 {offsets = [0, 64], sizes = [8, 32], strides = [1, 1]} : vector<8x96xf32> to vector<8x32xf32>
    %49 = arith.truncf %48 : vector<8x32xf32> to vector<8x32xbf16>
    %c0_21 = arith.constant 0 : index
    %c0_22 = arith.constant 0 : index
    %c0_23 = arith.constant 0 : index
    %50 = vector.load %arg9[%c0_21, %c0_22, %c0_23] : memref<1x8x32xbf16, #tpu.memory_space<vmem>>, vector<1x8x32xbf16>
    %51 = vector.shape_cast %50 : vector<1x8x32xbf16> to vector<8x32xbf16>
    %52 = vector.shape_cast %49 : vector<8x32xbf16> to vector<1x8x32xbf16>
    tpu.vector_store %arg9[%c0_21, %c0_22, %c0_23], %52 {strides = array<i32>} : memref<1x8x32xbf16, #tpu.memory_space<vmem>>, vector<1x8x32xbf16>,
    return
  }
  func.func @transform_0(%arg0: i32, %arg1: i32) -> (i32, i32, i32) {
    %c0_i32 = arith.constant 0 : i32
    %c0_i32_0 = arith.constant 0 : i32
    return %arg0, %arg1, %c0_i32 : i32, i32, i32
  }
  func.func @transform_1(%arg0: i32, %arg1: i32) -> (i32, i32) {
    %c0_i32 = arith.constant 0 : i32
    %c0_i32_0 = arith.constant 0 : i32
    %c0_i32_1 = arith.constant 0 : i32
    return %c0_i32, %c0_i32_0 : i32, i32
  }
  func.func @transform_2(%arg0: i32, %arg1: i32) -> (i32, i32) {
    %c0_i32 = arith.constant 0 : i32
    %c0_i32_0 = arith.constant 0 : i32
    %c0_i32_1 = arith.constant 0 : i32
    return %c0_i32, %c0_i32_0 : i32, i32
  }
  func.func @transform_3(%arg0: i32, %arg1: i32) -> (i32, i32) {
    %c0_i32 = arith.constant 0 : i32
    %c0_i32_0 = arith.constant 0 : i32
    %c0_i32_1 = arith.constant 0 : i32
    return %c0_i32, %c0_i32_0 : i32, i32
  }
  func.func @transform_4(%arg0: i32, %arg1: i32) -> (i32, i32) {
    %c0_i32 = arith.constant 0 : i32
    %c0_i32_0 = arith.constant 0 : i32
    %c0_i32_1 = arith.constant 0 : i32
    return %c0_i32, %c0_i32_0 : i32, i32
  }
  func.func @transform_5(%arg0: i32, %arg1: i32) -> (i32, i32, i32) {
    %c0_i32 = arith.constant 0 : i32
    %c0_i32_0 = arith.constant 0 : i32
    return %arg0, %arg1, %c0_i32 : i32, i32, i32
  }
  func.func @transform_6(%arg0: i32, %arg1: i32) -> (i32, i32, i32) {
    %c0_i32 = arith.constant 0 : i32
    %c0_i32_0 = arith.constant 0 : i32
    return %arg0, %arg1, %c0_i32 : i32, i32, i32
  }
  func.func @transform_7(%arg0: i32, %arg1: i32) -> (i32, i32, i32) {
    %c0_i32 = arith.constant 0 : i32
    %c0_i32_0 = arith.constant 0 : i32
    return %arg0, %arg1, %c0_i32 : i32, i32, i32
  }
}

module attributes {stable_mosaic.version = 11 : i64} {
  func.func @_attn_mlp_kernel(%arg0: i32, %arg1: i32, %arg2: i32, %arg3: memref<1x8x32xf32, #tpu.memory_space<vmem>>, %arg4: memref<1x8x32xbf16, #tpu.memory_space<vmem>>, %arg5: memref<1x8x32xbf16, #tpu.memory_space<vmem>>, %arg6: memref<1x8x32xbf16, #tpu.memory_space<vmem>>, %arg7: memref<32x32xbf16, #tpu.memory_space<vmem>>, %arg8: memref<1x32xf32, #tpu.memory_space<vmem>>, %arg9: memref<1x32xf32, #tpu.memory_space<vmem>>, %arg10: memref<1x32xf32, #tpu.memory_space<vmem>>, %arg11: memref<1x32xf32, #tpu.memory_space<vmem>>, %arg12: memref<32x128xbf16, #tpu.memory_space<vmem>>, %arg13: memref<1x128xf32, #tpu.memory_space<vmem>>, %arg14: memref<128x32xbf16, #tpu.memory_space<vmem>>, %arg15: memref<1x32xf32, #tpu.memory_space<vmem>>, %arg16: memref<1x32xf32, #tpu.memory_space<vmem>>, %arg17: memref<1x8x32xf32, #tpu.memory_space<vmem>>, %arg18: memref<8x32xf32, #tpu.memory_space<vmem>>, %arg19: memref<8x32xbf16, #tpu.memory_space<vmem>>, %arg20: memref<8x32xf32, #tpu.memory_space<vmem>>) attributes {dimension_semantics = [#tpu.dimension_semantics<parallel>, #tpu.dimension_semantics<parallel>, #tpu.dimension_semantics<arbitrary>], iteration_bounds = array<i64: 2, 1, 1>, scalar_prefetch = 0 : i64, scratch_operands = 3 : i64, tpu.core_type = #tpu.core_type<tc>, window_params = [{transform_indices = @transform_0, window_bounds = array<i64: 1, 8, 32>}, {transform_indices = @transform_1, window_bounds = array<i64: 1, 8, 32>}, {transform_indices = @transform_2, window_bounds = array<i64: 1, 8, 32>}, {transform_indices = @transform_3, window_bounds = array<i64: 1, 8, 32>}, {pipeline_mode = #tpu.pipeline_mode<synchronous>, transform_indices = @transform_4, window_bounds = array<i64: 32, 32>}, {pipeline_mode = #tpu.pipeline_mode<synchronous>, transform_indices = @transform_5, window_bounds = array<i64: 1, 32>}, {pipeline_mode = #tpu.pipeline_mode<synchronous>, transform_indices = @transform_6, window_bounds = array<i64: 1, 32>}, {pipeline_mode = #tpu.pipeline_mode<synchronous>, transform_indices = @transform_7, window_bounds = array<i64: 1, 32>}, {pipeline_mode = #tpu.pipeline_mode<synchronous>, transform_indices = @transform_8, window_bounds = array<i64: 1, 32>}, {transform_indices = @transform_9, window_bounds = array<i64: 32, 128>}, {transform_indices = @transform_10, window_bounds = array<i64: 1, 128>}, {transform_indices = @transform_11, window_bounds = array<i64: 128, 32>}, {pipeline_mode = #tpu.pipeline_mode<synchronous>, transform_indices = @transform_12, window_bounds = array<i64: 1, 32>}, {pipeline_mode = #tpu.pipeline_mode<synchronous>, transform_indices = @transform_13, window_bounds = array<i64: 1, 32>}, {transform_indices = @transform_14, window_bounds = array<i64: 1, 8, 32>}]} {
    %c0_i32 = arith.constant 0 : i32
    %0 = arith.cmpi eq, %arg2, %c0_i32 : i32
    %1 = arith.extui %0 : i1 to i32
    %c0_i32_0 = arith.constant 0 : i32
    %2 = arith.cmpi ne, %1, %c0_i32_0 : i32
    scf.if %2 {
      %c0_19 = arith.constant 0 : index
      %c0_20 = arith.constant 0 : index
      %c0_21 = arith.constant 0 : index
      %33 = vector.load %arg3[%c0_19, %c0_20, %c0_21] : memref<1x8x32xf32, #tpu.memory_space<vmem>>, vector<1x8x32xf32>
      %34 = vector.shape_cast %33 : vector<1x8x32xf32> to vector<8x32xf32>
      %c0_22 = arith.constant 0 : index
      %c0_23 = arith.constant 0 : index
      %c0_24 = arith.constant 0 : index
      %35 = vector.load %arg4[%c0_22, %c0_23, %c0_24] : memref<1x8x32xbf16, #tpu.memory_space<vmem>>, vector<1x8x8xbf16>
      %36 = vector.shape_cast %35 : vector<1x8x8xbf16> to vector<8x8xbf16>
      %c0_25 = arith.constant 0 : index
      %c0_26 = arith.constant 0 : index
      %c0_27 = arith.constant 0 : index
      %37 = vector.load %arg5[%c0_25, %c0_26, %c0_27] : memref<1x8x32xbf16, #tpu.memory_space<vmem>>, vector<1x8x8xbf16>
      %38 = vector.shape_cast %37 : vector<1x8x8xbf16> to vector<8x8xbf16>
      %c0_28 = arith.constant 0 : index
      %c0_29 = arith.constant 0 : index
      %c0_30 = arith.constant 0 : index
      %39 = vector.load %arg6[%c0_28, %c0_29, %c0_30] : memref<1x8x32xbf16, #tpu.memory_space<vmem>>, vector<1x8x8xbf16>
      %40 = vector.shape_cast %39 : vector<1x8x8xbf16> to vector<8x8xbf16>
      %cst_31 = arith.constant dense<0.000000e+00> : vector<8x8xf32>
      %41 = tpu.matmul %36, %38, %cst_31 {dimension_numbers = #tpu.dot_dimension_numbers<[1], [1], [0], [0], [0, 0, 1, 0], [], []>} : vector<8x8xbf16>, vector<8x8xbf16>, vector<8x8xf32> -> vector<8x8xf32>
      %cst_32 = arith.constant 0.353553385 : f32
      %42 = vector.broadcast %cst_32 : f32 to vector<8x8xf32>
      %43 = arith.mulf %41, %42 : vector<8x8xf32>
      %cst_33 = arith.constant dense<0xFF800000> : vector<8xf32>
      %44 = vector.multi_reduction <maximumf>, %43, %cst_33 [1] : vector<8x8xf32> to vector<8xf32>
      %45 = vector.shape_cast %44 : vector<8xf32> to vector<8x1xf32>
      %46 = vector.broadcast %45 : vector<8x1xf32> to vector<8x8xf32>
      %47 = arith.subf %43, %46 : vector<8x8xf32>
      %48 = math.exp %47 : vector<8x8xf32>
      %cst_34 = arith.constant dense<0.000000e+00> : vector<8xf32>
      %49 = vector.multi_reduction <add>, %48, %cst_34 [1] : vector<8x8xf32> to vector<8xf32>
      %50 = vector.shape_cast %49 : vector<8xf32> to vector<8x1xf32>
      %51 = tpu.reciprocal %50 {approx = true} : vector<8x1xf32> -> vector<8x1xf32>
      %52 = vector.broadcast %51 : vector<8x1xf32> to vector<8x8xf32>
      %53 = arith.mulf %48, %52 : vector<8x8xf32>
      %54 = arith.truncf %53 : vector<8x8xf32> to vector<8x8xbf16>
      %cst_35 = arith.constant dense<0.000000e+00> : vector<8x8xf32>
      %55 = tpu.matmul %54, %40, %cst_35 {dimension_numbers = #tpu.dot_dimension_numbers<[1], [0], [0], [1], [0, 0, 1, 1], [], []>} : vector<8x8xbf16>, vector<8x8xbf16>, vector<8x8xf32> -> vector<8x8xf32>
      %c0_36 = arith.constant 0 : index
      %c0_37 = arith.constant 0 : index
      %c8 = arith.constant 8 : index
      %56 = vector.load %arg4[%c0_36, %c0_37, %c8] : memref<1x8x32xbf16, #tpu.memory_space<vmem>>, vector<1x8x8xbf16>
      %57 = vector.shape_cast %56 : vector<1x8x8xbf16> to vector<8x8xbf16>
      %c0_38 = arith.constant 0 : index
      %c0_39 = arith.constant 0 : index
      %c8_40 = arith.constant 8 : index
      %58 = vector.load %arg5[%c0_38, %c0_39, %c8_40] : memref<1x8x32xbf16, #tpu.memory_space<vmem>>, vector<1x8x8xbf16>
      %59 = vector.shape_cast %58 : vector<1x8x8xbf16> to vector<8x8xbf16>
      %c0_41 = arith.constant 0 : index
      %c0_42 = arith.constant 0 : index
      %c8_43 = arith.constant 8 : index
      %60 = vector.load %arg6[%c0_41, %c0_42, %c8_43] : memref<1x8x32xbf16, #tpu.memory_space<vmem>>, vector<1x8x8xbf16>
      %61 = vector.shape_cast %60 : vector<1x8x8xbf16> to vector<8x8xbf16>
      %cst_44 = arith.constant dense<0.000000e+00> : vector<8x8xf32>
      %62 = tpu.matmul %57, %59, %cst_44 {dimension_numbers = #tpu.dot_dimension_numbers<[1], [1], [0], [0], [0, 0, 1, 0], [], []>} : vector<8x8xbf16>, vector<8x8xbf16>, vector<8x8xf32> -> vector<8x8xf32>
      %cst_45 = arith.constant 0.353553385 : f32
      %63 = vector.broadcast %cst_45 : f32 to vector<8x8xf32>
      %64 = arith.mulf %62, %63 : vector<8x8xf32>
      %cst_46 = arith.constant dense<0xFF800000> : vector<8xf32>
      %65 = vector.multi_reduction <maximumf>, %64, %cst_46 [1] : vector<8x8xf32> to vector<8xf32>
      %66 = vector.shape_cast %65 : vector<8xf32> to vector<8x1xf32>
      %67 = vector.broadcast %66 : vector<8x1xf32> to vector<8x8xf32>
      %68 = arith.subf %64, %67 : vector<8x8xf32>
      %69 = math.exp %68 : vector<8x8xf32>
      %cst_47 = arith.constant dense<0.000000e+00> : vector<8xf32>
      %70 = vector.multi_reduction <add>, %69, %cst_47 [1] : vector<8x8xf32> to vector<8xf32>
      %71 = vector.shape_cast %70 : vector<8xf32> to vector<8x1xf32>
      %72 = tpu.reciprocal %71 {approx = true} : vector<8x1xf32> -> vector<8x1xf32>
      %73 = vector.broadcast %72 : vector<8x1xf32> to vector<8x8xf32>
      %74 = arith.mulf %69, %73 : vector<8x8xf32>
      %75 = arith.truncf %74 : vector<8x8xf32> to vector<8x8xbf16>
      %cst_48 = arith.constant dense<0.000000e+00> : vector<8x8xf32>
      %76 = tpu.matmul %75, %61, %cst_48 {dimension_numbers = #tpu.dot_dimension_numbers<[1], [0], [0], [1], [0, 0, 1, 1], [], []>} : vector<8x8xbf16>, vector<8x8xbf16>, vector<8x8xf32> -> vector<8x8xf32>
      %c0_49 = arith.constant 0 : index
      %c0_50 = arith.constant 0 : index
      %c16 = arith.constant 16 : index
      %77 = vector.load %arg4[%c0_49, %c0_50, %c16] : memref<1x8x32xbf16, #tpu.memory_space<vmem>>, vector<1x8x8xbf16>
      %78 = vector.shape_cast %77 : vector<1x8x8xbf16> to vector<8x8xbf16>
      %c0_51 = arith.constant 0 : index
      %c0_52 = arith.constant 0 : index
      %c16_53 = arith.constant 16 : index
      %79 = vector.load %arg5[%c0_51, %c0_52, %c16_53] : memref<1x8x32xbf16, #tpu.memory_space<vmem>>, vector<1x8x8xbf16>
      %80 = vector.shape_cast %79 : vector<1x8x8xbf16> to vector<8x8xbf16>
      %c0_54 = arith.constant 0 : index
      %c0_55 = arith.constant 0 : index
      %c16_56 = arith.constant 16 : index
      %81 = vector.load %arg6[%c0_54, %c0_55, %c16_56] : memref<1x8x32xbf16, #tpu.memory_space<vmem>>, vector<1x8x8xbf16>
      %82 = vector.shape_cast %81 : vector<1x8x8xbf16> to vector<8x8xbf16>
      %cst_57 = arith.constant dense<0.000000e+00> : vector<8x8xf32>
      %83 = tpu.matmul %78, %80, %cst_57 {dimension_numbers = #tpu.dot_dimension_numbers<[1], [1], [0], [0], [0, 0, 1, 0], [], []>} : vector<8x8xbf16>, vector<8x8xbf16>, vector<8x8xf32> -> vector<8x8xf32>
      %cst_58 = arith.constant 0.353553385 : f32
      %84 = vector.broadcast %cst_58 : f32 to vector<8x8xf32>
      %85 = arith.mulf %83, %84 : vector<8x8xf32>
      %cst_59 = arith.constant dense<0xFF800000> : vector<8xf32>
      %86 = vector.multi_reduction <maximumf>, %85, %cst_59 [1] : vector<8x8xf32> to vector<8xf32>
      %87 = vector.shape_cast %86 : vector<8xf32> to vector<8x1xf32>
      %88 = vector.broadcast %87 : vector<8x1xf32> to vector<8x8xf32>
      %89 = arith.subf %85, %88 : vector<8x8xf32>
      %90 = math.exp %89 : vector<8x8xf32>
      %cst_60 = arith.constant dense<0.000000e+00> : vector<8xf32>
      %91 = vector.multi_reduction <add>, %90, %cst_60 [1] : vector<8x8xf32> to vector<8xf32>
      %92 = vector.shape_cast %91 : vector<8xf32> to vector<8x1xf32>
      %93 = tpu.reciprocal %92 {approx = true} : vector<8x1xf32> -> vector<8x1xf32>
      %94 = vector.broadcast %93 : vector<8x1xf32> to vector<8x8xf32>
      %95 = arith.mulf %90, %94 : vector<8x8xf32>
      %96 = arith.truncf %95 : vector<8x8xf32> to vector<8x8xbf16>
      %cst_61 = arith.constant dense<0.000000e+00> : vector<8x8xf32>
      %97 = tpu.matmul %96, %82, %cst_61 {dimension_numbers = #tpu.dot_dimension_numbers<[1], [0], [0], [1], [0, 0, 1, 1], [], []>} : vector<8x8xbf16>, vector<8x8xbf16>, vector<8x8xf32> -> vector<8x8xf32>
      %c0_62 = arith.constant 0 : index
      %c0_63 = arith.constant 0 : index
      %c24 = arith.constant 24 : index
      %98 = vector.load %arg4[%c0_62, %c0_63, %c24] : memref<1x8x32xbf16, #tpu.memory_space<vmem>>, vector<1x8x8xbf16>
      %99 = vector.shape_cast %98 : vector<1x8x8xbf16> to vector<8x8xbf16>
      %c0_64 = arith.constant 0 : index
      %c0_65 = arith.constant 0 : index
      %c24_66 = arith.constant 24 : index
      %100 = vector.load %arg5[%c0_64, %c0_65, %c24_66] : memref<1x8x32xbf16, #tpu.memory_space<vmem>>, vector<1x8x8xbf16>
      %101 = vector.shape_cast %100 : vector<1x8x8xbf16> to vector<8x8xbf16>
      %c0_67 = arith.constant 0 : index
      %c0_68 = arith.constant 0 : index
      %c24_69 = arith.constant 24 : index
      %102 = vector.load %arg6[%c0_67, %c0_68, %c24_69] : memref<1x8x32xbf16, #tpu.memory_space<vmem>>, vector<1x8x8xbf16>
      %103 = vector.shape_cast %102 : vector<1x8x8xbf16> to vector<8x8xbf16>
      %cst_70 = arith.constant dense<0.000000e+00> : vector<8x8xf32>
      %104 = tpu.matmul %99, %101, %cst_70 {dimension_numbers = #tpu.dot_dimension_numbers<[1], [1], [0], [0], [0, 0, 1, 0], [], []>} : vector<8x8xbf16>, vector<8x8xbf16>, vector<8x8xf32> -> vector<8x8xf32>
      %cst_71 = arith.constant 0.353553385 : f32
      %105 = vector.broadcast %cst_71 : f32 to vector<8x8xf32>
      %106 = arith.mulf %104, %105 : vector<8x8xf32>
      %cst_72 = arith.constant dense<0xFF800000> : vector<8xf32>
      %107 = vector.multi_reduction <maximumf>, %106, %cst_72 [1] : vector<8x8xf32> to vector<8xf32>
      %108 = vector.shape_cast %107 : vector<8xf32> to vector<8x1xf32>
      %109 = vector.broadcast %108 : vector<8x1xf32> to vector<8x8xf32>
      %110 = arith.subf %106, %109 : vector<8x8xf32>
      %111 = math.exp %110 : vector<8x8xf32>
      %cst_73 = arith.constant dense<0.000000e+00> : vector<8xf32>
      %112 = vector.multi_reduction <add>, %111, %cst_73 [1] : vector<8x8xf32> to vector<8xf32>
      %113 = vector.shape_cast %112 : vector<8xf32> to vector<8x1xf32>
      %114 = tpu.reciprocal %113 {approx = true} : vector<8x1xf32> -> vector<8x1xf32>
      %115 = vector.broadcast %114 : vector<8x1xf32> to vector<8x8xf32>
      %116 = arith.mulf %111, %115 : vector<8x8xf32>
      %117 = arith.truncf %116 : vector<8x8xf32> to vector<8x8xbf16>
      %cst_74 = arith.constant dense<0.000000e+00> : vector<8x8xf32>
      %118 = tpu.matmul %117, %103, %cst_74 {dimension_numbers = #tpu.dot_dimension_numbers<[1], [0], [0], [1], [0, 0, 1, 1], [], []>} : vector<8x8xbf16>, vector<8x8xbf16>, vector<8x8xf32> -> vector<8x8xf32>
      %119 = tpu.concatenate %55, %76, %97, %118 in 1 : vector<8x8xf32>, vector<8x8xf32>, vector<8x8xf32>, vector<8x8xf32> -> vector<8x32xf32>
      %120 = arith.truncf %119 : vector<8x32xf32> to vector<8x32xbf16>
      %c0_75 = arith.constant 0 : index
      %c0_76 = arith.constant 0 : index
      %121 = vector.load %arg7[%c0_75, %c0_76] : memref<32x32xbf16, #tpu.memory_space<vmem>>, vector<32x32xbf16>
      %cst_77 = arith.constant dense<0.000000e+00> : vector<8x32xf32>
      %122 = tpu.matmul %120, %121, %cst_77 {dimension_numbers = #tpu.dot_dimension_numbers<[1], [0], [0], [1], [0, 0, 1, 1], [], []>} : vector<8x32xbf16>, vector<32x32xbf16>, vector<8x32xf32> -> vector<8x32xf32>
      %c0_78 = arith.constant 0 : index
      %c0_79 = arith.constant 0 : index
      %123 = vector.load %arg8[%c0_78, %c0_79] : memref<1x32xf32, #tpu.memory_space<vmem>>, vector<1x32xf32>
      %124 = vector.shape_cast %123 : vector<1x32xf32> to vector<32xf32>
      %125 = vector.shape_cast %124 : vector<32xf32> to vector<1x32xf32>
      %126 = vector.broadcast %125 : vector<1x32xf32> to vector<8x32xf32>
      %127 = arith.addf %122, %126 : vector<8x32xf32>
      %c0_80 = arith.constant 0 : index
      %c0_81 = arith.constant 0 : index
      %128 = vector.load %arg9[%c0_80, %c0_81] : memref<1x32xf32, #tpu.memory_space<vmem>>, vector<1x32xf32>
      %129 = vector.shape_cast %128 : vector<1x32xf32> to vector<32xf32>
      %130 = vector.shape_cast %129 : vector<32xf32> to vector<1x32xf32>
      %131 = vector.broadcast %130 : vector<1x32xf32> to vector<8x32xf32>
      %132 = arith.mulf %127, %131 : vector<8x32xf32>
      %133 = arith.addf %34, %132 : vector<8x32xf32>
      %c0_82 = arith.constant 0 : index
      %c0_83 = arith.constant 0 : index
      %134 = vector.load %arg18[%c0_82, %c0_83] : memref<8x32xf32, #tpu.memory_space<vmem>>, vector<8x32xf32>
      tpu.vector_store %arg18[%c0_82, %c0_83], %133 {strides = array<i32>} : memref<8x32xf32, #tpu.memory_space<vmem>>, vector<8x32xf32>,
      %cst_84 = arith.constant dense<0.000000e+00> : vector<8xf32>
      %135 = vector.multi_reduction <add>, %133, %cst_84 [1] : vector<8x32xf32> to vector<8xf32>
      %136 = vector.shape_cast %135 : vector<8xf32> to vector<8x1xf32>
      %cst_85 = arith.constant 3.200000e+01 : f32
      %137 = vector.broadcast %cst_85 : f32 to vector<8x1xf32>
      %138 = arith.divf %136, %137 : vector<8x1xf32>
      %139 = vector.broadcast %138 : vector<8x1xf32> to vector<8x32xf32>
      %140 = arith.subf %133, %139 : vector<8x32xf32>
      %141 = arith.mulf %140, %140 : vector<8x32xf32>
      %cst_86 = arith.constant dense<0.000000e+00> : vector<8xf32>
      %142 = vector.multi_reduction <add>, %141, %cst_86 [1] : vector<8x32xf32> to vector<8xf32>
      %143 = vector.shape_cast %142 : vector<8xf32> to vector<8x1xf32>
      %cst_87 = arith.constant 3.200000e+01 : f32
      %144 = vector.broadcast %cst_87 : f32 to vector<8x1xf32>
      %145 = arith.divf %143, %144 : vector<8x1xf32>
      %146 = vector.broadcast %138 : vector<8x1xf32> to vector<8x32xf32>
      %147 = arith.subf %133, %146 : vector<8x32xf32>
      %cst_88 = arith.constant 9.99999997E-7 : f32
      %148 = vector.broadcast %cst_88 : f32 to vector<8x1xf32>
      %149 = arith.addf %145, %148 : vector<8x1xf32>
      %150 = math.rsqrt %149 : vector<8x1xf32>
      %151 = vector.broadcast %150 : vector<8x1xf32> to vector<8x32xf32>
      %152 = arith.mulf %147, %151 : vector<8x32xf32>
      %c0_89 = arith.constant 0 : index
      %c0_90 = arith.constant 0 : index
      %153 = vector.load %arg10[%c0_89, %c0_90] : memref<1x32xf32, #tpu.memory_space<vmem>>, vector<1x32xf32>
      %154 = vector.shape_cast %153 : vector<1x32xf32> to vector<32xf32>
      %155 = vector.shape_cast %154 : vector<32xf32> to vector<1x32xf32>
      %156 = vector.broadcast %155 : vector<1x32xf32> to vector<8x32xf32>
      %157 = arith.mulf %152, %156 : vector<8x32xf32>
      %c0_91 = arith.constant 0 : index
      %c0_92 = arith.constant 0 : index
      %158 = vector.load %arg11[%c0_91, %c0_92] : memref<1x32xf32, #tpu.memory_space<vmem>>, vector<1x32xf32>
      %159 = vector.shape_cast %158 : vector<1x32xf32> to vector<32xf32>
      %160 = vector.shape_cast %159 : vector<32xf32> to vector<1x32xf32>
      %161 = vector.broadcast %160 : vector<1x32xf32> to vector<8x32xf32>
      %162 = arith.addf %157, %161 : vector<8x32xf32>
      %163 = arith.truncf %162 : vector<8x32xf32> to vector<8x32xbf16>
      %c0_93 = arith.constant 0 : index
      %c0_94 = arith.constant 0 : index
      %164 = vector.load %arg19[%c0_93, %c0_94] : memref<8x32xbf16, #tpu.memory_space<vmem>>, vector<8x32xbf16>
      tpu.vector_store %arg19[%c0_93, %c0_94], %163 {strides = array<i32>} : memref<8x32xbf16, #tpu.memory_space<vmem>>, vector<8x32xbf16>,
      %cst_95 = arith.constant 0.000000e+00 : f32
      %165 = vector.broadcast %cst_95 : f32 to vector<8x32xf32>
      %c0_96 = arith.constant 0 : index
      %c0_97 = arith.constant 0 : index
      %166 = vector.load %arg20[%c0_96, %c0_97] : memref<8x32xf32, #tpu.memory_space<vmem>>, vector<8x32xf32>
      tpu.vector_store %arg20[%c0_96, %c0_97], %165 {strides = array<i32>} : memref<8x32xf32, #tpu.memory_space<vmem>>, vector<8x32xf32>,
    } else {
    }
    %c0 = arith.constant 0 : index
    %c0_1 = arith.constant 0 : index
    %3 = vector.load %arg19[%c0, %c0_1] : memref<8x32xbf16, #tpu.memory_space<vmem>>, vector<8x32xbf16>
    %c0_2 = arith.constant 0 : index
    %c0_3 = arith.constant 0 : index
    %4 = vector.load %arg12[%c0_2, %c0_3] : memref<32x128xbf16, #tpu.memory_space<vmem>>, vector<32x128xbf16>
    %cst = arith.constant dense<0.000000e+00> : vector<8x128xf32>
    %5 = tpu.matmul %3, %4, %cst {dimension_numbers = #tpu.dot_dimension_numbers<[1], [0], [0], [1], [0, 0, 1, 1], [], []>} : vector<8x32xbf16>, vector<32x128xbf16>, vector<8x128xf32> -> vector<8x128xf32>
    %c0_4 = arith.constant 0 : index
    %c0_5 = arith.constant 0 : index
    %6 = vector.load %arg13[%c0_4, %c0_5] : memref<1x128xf32, #tpu.memory_space<vmem>>, vector<1x128xf32>
    %7 = vector.shape_cast %6 : vector<1x128xf32> to vector<128xf32>
    %8 = vector.shape_cast %7 : vector<128xf32> to vector<1x128xf32>
    %9 = vector.broadcast %8 : vector<1x128xf32> to vector<8x128xf32>
    %10 = arith.addf %5, %9 : vector<8x128xf32>
    %11 = arith.mulf %10, %10 : vector<8x128xf32>
    %12 = arith.mulf %10, %11 : vector<8x128xf32>
    %cst_6 = arith.constant 4.471500e-02 : f32
    %13 = vector.broadcast %cst_6 : f32 to vector<8x128xf32>
    %14 = arith.mulf %13, %12 : vector<8x128xf32>
    %15 = arith.addf %10, %14 : vector<8x128xf32>
    %cst_7 = arith.constant 0.797884583 : f32
    %16 = vector.broadcast %cst_7 : f32 to vector<8x128xf32>
    %17 = arith.mulf %16, %15 : vector<8x128xf32>
    %18 = math.tanh %17 : vector<8x128xf32>
    %cst_8 = arith.constant 1.000000e+00 : f32
    %19 = vector.broadcast %cst_8 : f32 to vector<8x128xf32>
    %20 = arith.addf %19, %18 : vector<8x128xf32>
    %cst_9 = arith.constant 5.000000e-01 : f32
    %21 = vector.broadcast %cst_9 : f32 to vector<8x128xf32>
    %22 = arith.mulf %21, %20 : vector<8x128xf32>
    %23 = arith.mulf %10, %22 : vector<8x128xf32>
    %c0_10 = arith.constant 0 : index
    %c0_11 = arith.constant 0 : index
    %24 = vector.load %arg20[%c0_10, %c0_11] : memref<8x32xf32, #tpu.memory_space<vmem>>, vector<8x32xf32>
    %25 = arith.truncf %23 : vector<8x128xf32> to vector<8x128xbf16>
    %c0_12 = arith.constant 0 : index
    %c0_13 = arith.constant 0 : index
    %26 = vector.load %arg14[%c0_12, %c0_13] : memref<128x32xbf16, #tpu.memory_space<vmem>>, vector<128x32xbf16>
    %cst_14 = arith.constant dense<0.000000e+00> : vector<8x32xf32>
    %27 = tpu.matmul %25, %26, %cst_14 {dimension_numbers = #tpu.dot_dimension_numbers<[1], [0], [0], [1], [0, 0, 1, 1], [], []>} : vector<8x128xbf16>, vector<128x32xbf16>, vector<8x32xf32> -> vector<8x32xf32>
    %28 = arith.addf %24, %27 : vector<8x32xf32>
    %c0_15 = arith.constant 0 : index
    %c0_16 = arith.constant 0 : index
    %29 = vector.load %arg20[%c0_15, %c0_16] : memref<8x32xf32, #tpu.memory_space<vmem>>, vector<8x32xf32>
    tpu.vector_store %arg20[%c0_15, %c0_16], %28 {strides = array<i32>} : memref<8x32xf32, #tpu.memory_space<vmem>>, vector<8x32xf32>,
    %c0_i32_17 = arith.constant 0 : i32
    %30 = arith.cmpi eq, %arg2, %c0_i32_17 : i32
    %31 = arith.extui %30 : i1 to i32
    %c0_i32_18 = arith.constant 0 : i32
    %32 = arith.cmpi ne, %31, %c0_i32_18 : i32
    scf.if %32 {
      %c0_19 = arith.constant 0 : index
      %c0_20 = arith.constant 0 : index
      %33 = vector.load %arg18[%c0_19, %c0_20] : memref<8x32xf32, #tpu.memory_space<vmem>>, vector<8x32xf32>
      %c0_21 = arith.constant 0 : index
      %c0_22 = arith.constant 0 : index
      %34 = vector.load %arg20[%c0_21, %c0_22] : memref<8x32xf32, #tpu.memory_space<vmem>>, vector<8x32xf32>
      %c0_23 = arith.constant 0 : index
      %c0_24 = arith.constant 0 : index
      %35 = vector.load %arg15[%c0_23, %c0_24] : memref<1x32xf32, #tpu.memory_space<vmem>>, vector<1x32xf32>
      %36 = vector.shape_cast %35 : vector<1x32xf32> to vector<32xf32>
      %37 = vector.shape_cast %36 : vector<32xf32> to vector<1x32xf32>
      %38 = vector.broadcast %37 : vector<1x32xf32> to vector<8x32xf32>
      %39 = arith.addf %34, %38 : vector<8x32xf32>
      %c0_25 = arith.constant 0 : index
      %c0_26 = arith.constant 0 : index
      %40 = vector.load %arg16[%c0_25, %c0_26] : memref<1x32xf32, #tpu.memory_space<vmem>>, vector<1x32xf32>
      %41 = vector.shape_cast %40 : vector<1x32xf32> to vector<32xf32>
      %42 = vector.shape_cast %41 : vector<32xf32> to vector<1x32xf32>
      %43 = vector.broadcast %42 : vector<1x32xf32> to vector<8x32xf32>
      %44 = arith.mulf %39, %43 : vector<8x32xf32>
      %45 = arith.addf %33, %44 : vector<8x32xf32>
      %c0_27 = arith.constant 0 : index
      %c0_28 = arith.constant 0 : index
      %c0_29 = arith.constant 0 : index
      %46 = vector.load %arg17[%c0_27, %c0_28, %c0_29] : memref<1x8x32xf32, #tpu.memory_space<vmem>>, vector<1x8x32xf32>
      %47 = vector.shape_cast %46 : vector<1x8x32xf32> to vector<8x32xf32>
      %48 = vector.shape_cast %45 : vector<8x32xf32> to vector<1x8x32xf32>
      tpu.vector_store %arg17[%c0_27, %c0_28, %c0_29], %48 {strides = array<i32>} : memref<1x8x32xf32, #tpu.memory_space<vmem>>, vector<1x8x32xf32>,
    } else {
    }
    return
  }
  func.func @transform_0(%arg0: i32, %arg1: i32, %arg2: i32) -> (i32, i32, i32) {
    %c0_i32 = arith.constant 0 : i32
    %c0_i32_0 = arith.constant 0 : i32
    return %arg0, %arg1, %c0_i32 : i32, i32, i32
  }
  func.func @transform_1(%arg0: i32, %arg1: i32, %arg2: i32) -> (i32, i32, i32) {
    %c0_i32 = arith.constant 0 : i32
    %c0_i32_0 = arith.constant 0 : i32
    return %arg0, %arg1, %c0_i32 : i32, i32, i32
  }
  func.func @transform_2(%arg0: i32, %arg1: i32, %arg2: i32) -> (i32, i32, i32) {
    %c0_i32 = arith.constant 0 : i32
    %c0_i32_0 = arith.constant 0 : i32
    %c0_i32_1 = arith.constant 0 : i32
    return %arg0, %c0_i32, %c0_i32_0 : i32, i32, i32
  }
  func.func @transform_3(%arg0: i32, %arg1: i32, %arg2: i32) -> (i32, i32, i32) {
    %c0_i32 = arith.constant 0 : i32
    %c0_i32_0 = arith.constant 0 : i32
    %c0_i32_1 = arith.constant 0 : i32
    return %arg0, %c0_i32, %c0_i32_0 : i32, i32, i32
  }
  func.func @transform_4(%arg0: i32, %arg1: i32, %arg2: i32) -> (i32, i32) {
    %c0_i32 = arith.constant 0 : i32
    %c0_i32_0 = arith.constant 0 : i32
    %c0_i32_1 = arith.constant 0 : i32
    return %c0_i32, %c0_i32_0 : i32, i32
  }
  func.func @transform_5(%arg0: i32, %arg1: i32, %arg2: i32) -> (i32, i32) {
    %c0_i32 = arith.constant 0 : i32
    %c0_i32_0 = arith.constant 0 : i32
    %c0_i32_1 = arith.constant 0 : i32
    return %c0_i32, %c0_i32_0 : i32, i32
  }
  func.func @transform_6(%arg0: i32, %arg1: i32, %arg2: i32) -> (i32, i32) {
    %c0_i32 = arith.constant 0 : i32
    %c0_i32_0 = arith.constant 0 : i32
    %c0_i32_1 = arith.constant 0 : i32
    return %c0_i32, %c0_i32_0 : i32, i32
  }
  func.func @transform_7(%arg0: i32, %arg1: i32, %arg2: i32) -> (i32, i32) {
    %c0_i32 = arith.constant 0 : i32
    %c0_i32_0 = arith.constant 0 : i32
    %c0_i32_1 = arith.constant 0 : i32
    return %c0_i32, %c0_i32_0 : i32, i32
  }
  func.func @transform_8(%arg0: i32, %arg1: i32, %arg2: i32) -> (i32, i32) {
    %c0_i32 = arith.constant 0 : i32
    %c0_i32_0 = arith.constant 0 : i32
    %c0_i32_1 = arith.constant 0 : i32
    return %c0_i32, %c0_i32_0 : i32, i32
  }
  func.func @transform_9(%arg0: i32, %arg1: i32, %arg2: i32) -> (i32, i32) {
    %c0_i32 = arith.constant 0 : i32
    %c0_i32_0 = arith.constant 0 : i32
    return %c0_i32, %arg2 : i32, i32
  }
  func.func @transform_10(%arg0: i32, %arg1: i32, %arg2: i32) -> (i32, i32) {
    %c0_i32 = arith.constant 0 : i32
    %c0_i32_0 = arith.constant 0 : i32
    return %c0_i32, %arg2 : i32, i32
  }
  func.func @transform_11(%arg0: i32, %arg1: i32, %arg2: i32) -> (i32, i32) {
    %c0_i32 = arith.constant 0 : i32
    %c0_i32_0 = arith.constant 0 : i32
    return %arg2, %c0_i32 : i32, i32
  }
  func.func @transform_12(%arg0: i32, %arg1: i32, %arg2: i32) -> (i32, i32) {
    %c0_i32 = arith.constant 0 : i32
    %c0_i32_0 = arith.constant 0 : i32
    %c0_i32_1 = arith.constant 0 : i32
    return %c0_i32, %c0_i32_0 : i32, i32
  }
  func.func @transform_13(%arg0: i32, %arg1: i32, %arg2: i32) -> (i32, i32) {
    %c0_i32 = arith.constant 0 : i32
    %c0_i32_0 = arith.constant 0 : i32
    %c0_i32_1 = arith.constant 0 : i32
    return %c0_i32, %c0_i32_0 : i32, i32
  }
  func.func @transform_14(%arg0: i32, %arg1: i32, %arg2: i32) -> (i32, i32, i32) {
    %c0_i32 = arith.constant 0 : i32
    %c0_i32_0 = arith.constant 0 : i32
    return %arg0, %arg1, %c0_i32 : i32, i32, i32
  }
}

module attributes {stable_mosaic.version = 11 : i64} {
  func.func @_attn_mlp_kernel(%arg0: i32, %arg1: i32, %arg2: i32, %arg3: memref<1x8x32xf32, #tpu.memory_space<vmem>>, %arg4: memref<1x8x32xbf16, #tpu.memory_space<vmem>>, %arg5: memref<1x8x32xbf16, #tpu.memory_space<vmem>>, %arg6: memref<1x8x32xbf16, #tpu.memory_space<vmem>>, %arg7: memref<32x32xbf16, #tpu.memory_space<vmem>>, %arg8: memref<1x32xf32, #tpu.memory_space<vmem>>, %arg9: memref<1x32xf32, #tpu.memory_space<vmem>>, %arg10: memref<1x32xf32, #tpu.memory_space<vmem>>, %arg11: memref<1x32xf32, #tpu.memory_space<vmem>>, %arg12: memref<32x128xbf16, #tpu.memory_space<vmem>>, %arg13: memref<1x128xf32, #tpu.memory_space<vmem>>, %arg14: memref<128x32xbf16, #tpu.memory_space<vmem>>, %arg15: memref<1x32xf32, #tpu.memory_space<vmem>>, %arg16: memref<1x32xf32, #tpu.memory_space<vmem>>, %arg17: memref<1x8x32xf32, #tpu.memory_space<vmem>>, %arg18: memref<8x32xf32, #tpu.memory_space<vmem>>, %arg19: memref<8x32xbf16, #tpu.memory_space<vmem>>, %arg20: memref<8x32xf32, #tpu.memory_space<vmem>>) attributes {dimension_semantics = [#tpu.dimension_semantics<parallel>, #tpu.dimension_semantics<parallel>, #tpu.dimension_semantics<arbitrary>], iteration_bounds = array<i64: 2, 1, 1>, scalar_prefetch = 0 : i64, scratch_operands = 3 : i64, tpu.core_type = #tpu.core_type<tc>, window_params = [{transform_indices = @transform_0, window_bounds = array<i64: 1, 8, 32>}, {transform_indices = @transform_1, window_bounds = array<i64: 1, 8, 32>}, {transform_indices = @transform_2, window_bounds = array<i64: 1, 8, 32>}, {transform_indices = @transform_3, window_bounds = array<i64: 1, 8, 32>}, {pipeline_mode = #tpu.pipeline_mode<synchronous>, transform_indices = @transform_4, window_bounds = array<i64: 32, 32>}, {pipeline_mode = #tpu.pipeline_mode<synchronous>, transform_indices = @transform_5, window_bounds = array<i64: 1, 32>}, {pipeline_mode = #tpu.pipeline_mode<synchronous>, transform_indices = @transform_6, window_bounds = array<i64: 1, 32>}, {pipeline_mode = #tpu.pipeline_mode<synchronous>, transform_indices = @transform_7, window_bounds = array<i64: 1, 32>}, {pipeline_mode = #tpu.pipeline_mode<synchronous>, transform_indices = @transform_8, window_bounds = array<i64: 1, 32>}, {transform_indices = @transform_9, window_bounds = array<i64: 32, 128>}, {transform_indices = @transform_10, window_bounds = array<i64: 1, 128>}, {transform_indices = @transform_11, window_bounds = array<i64: 128, 32>}, {pipeline_mode = #tpu.pipeline_mode<synchronous>, transform_indices = @transform_12, window_bounds = array<i64: 1, 32>}, {pipeline_mode = #tpu.pipeline_mode<synchronous>, transform_indices = @transform_13, window_bounds = array<i64: 1, 32>}, {transform_indices = @transform_14, window_bounds = array<i64: 1, 8, 32>}]} {
    %c0_i32 = arith.constant 0 : i32
    %0 = arith.cmpi eq, %arg2, %c0_i32 : i32
    %1 = arith.extui %0 : i1 to i32
    %c0_i32_0 = arith.constant 0 : i32
    %2 = arith.cmpi ne, %1, %c0_i32_0 : i32
    scf.if %2 {
      %c0_19 = arith.constant 0 : index
      %c0_20 = arith.constant 0 : index
      %c0_21 = arith.constant 0 : index
      %33 = vector.load %arg3[%c0_19, %c0_20, %c0_21] : memref<1x8x32xf32, #tpu.memory_space<vmem>>, vector<1x8x32xf32>
      %34 = vector.shape_cast %33 : vector<1x8x32xf32> to vector<8x32xf32>
      %c0_22 = arith.constant 0 : index
      %c0_23 = arith.constant 0 : index
      %c0_24 = arith.constant 0 : index
      %35 = vector.load %arg4[%c0_22, %c0_23, %c0_24] : memref<1x8x32xbf16, #tpu.memory_space<vmem>>, vector<1x8x8xbf16>
      %36 = vector.shape_cast %35 : vector<1x8x8xbf16> to vector<8x8xbf16>
      %c0_25 = arith.constant 0 : index
      %c0_26 = arith.constant 0 : index
      %c0_27 = arith.constant 0 : index
      %37 = vector.load %arg5[%c0_25, %c0_26, %c0_27] : memref<1x8x32xbf16, #tpu.memory_space<vmem>>, vector<1x8x8xbf16>
      %38 = vector.shape_cast %37 : vector<1x8x8xbf16> to vector<8x8xbf16>
      %c0_28 = arith.constant 0 : index
      %c0_29 = arith.constant 0 : index
      %c0_30 = arith.constant 0 : index
      %39 = vector.load %arg6[%c0_28, %c0_29, %c0_30] : memref<1x8x32xbf16, #tpu.memory_space<vmem>>, vector<1x8x8xbf16>
      %40 = vector.shape_cast %39 : vector<1x8x8xbf16> to vector<8x8xbf16>
      %cst_31 = arith.constant dense<0.000000e+00> : vector<8x8xf32>
      %41 = tpu.matmul %36, %38, %cst_31 {dimension_numbers = #tpu.dot_dimension_numbers<[1], [1], [0], [0], [0, 0, 1, 0], [], []>} : vector<8x8xbf16>, vector<8x8xbf16>, vector<8x8xf32> -> vector<8x8xf32>
      %cst_32 = arith.constant 0.353553385 : f32
      %42 = vector.broadcast %cst_32 : f32 to vector<8x8xf32>
      %43 = arith.mulf %41, %42 : vector<8x8xf32>
      %cst_33 = arith.constant dense<0xFF800000> : vector<8xf32>
      %44 = vector.multi_reduction <maximumf>, %43, %cst_33 [1] : vector<8x8xf32> to vector<8xf32>
      %45 = vector.shape_cast %44 : vector<8xf32> to vector<8x1xf32>
      %46 = vector.broadcast %45 : vector<8x1xf32> to vector<8x8xf32>
      %47 = arith.subf %43, %46 : vector<8x8xf32>
      %48 = math.exp %47 : vector<8x8xf32>
      %cst_34 = arith.constant dense<0.000000e+00> : vector<8xf32>
      %49 = vector.multi_reduction <add>, %48, %cst_34 [1] : vector<8x8xf32> to vector<8xf32>
      %50 = vector.shape_cast %49 : vector<8xf32> to vector<8x1xf32>
      %51 = tpu.reciprocal %50 {approx = true} : vector<8x1xf32> -> vector<8x1xf32>
      %52 = vector.broadcast %51 : vector<8x1xf32> to vector<8x8xf32>
      %53 = arith.mulf %48, %52 : vector<8x8xf32>
      %54 = arith.truncf %53 : vector<8x8xf32> to vector<8x8xbf16>
      %cst_35 = arith.constant dense<0.000000e+00> : vector<8x8xf32>
      %55 = tpu.matmul %54, %40, %cst_35 {dimension_numbers = #tpu.dot_dimension_numbers<[1], [0], [0], [1], [0, 0, 1, 1], [], []>} : vector<8x8xbf16>, vector<8x8xbf16>, vector<8x8xf32> -> vector<8x8xf32>
      %c0_36 = arith.constant 0 : index
      %c0_37 = arith.constant 0 : index
      %c8 = arith.constant 8 : index
      %56 = vector.load %arg4[%c0_36, %c0_37, %c8] : memref<1x8x32xbf16, #tpu.memory_space<vmem>>, vector<1x8x8xbf16>
      %57 = vector.shape_cast %56 : vector<1x8x8xbf16> to vector<8x8xbf16>
      %c0_38 = arith.constant 0 : index
      %c0_39 = arith.constant 0 : index
      %c8_40 = arith.constant 8 : index
      %58 = vector.load %arg5[%c0_38, %c0_39, %c8_40] : memref<1x8x32xbf16, #tpu.memory_space<vmem>>, vector<1x8x8xbf16>
      %59 = vector.shape_cast %58 : vector<1x8x8xbf16> to vector<8x8xbf16>
      %c0_41 = arith.constant 0 : index
      %c0_42 = arith.constant 0 : index
      %c8_43 = arith.constant 8 : index
      %60 = vector.load %arg6[%c0_41, %c0_42, %c8_43] : memref<1x8x32xbf16, #tpu.memory_space<vmem>>, vector<1x8x8xbf16>
      %61 = vector.shape_cast %60 : vector<1x8x8xbf16> to vector<8x8xbf16>
      %cst_44 = arith.constant dense<0.000000e+00> : vector<8x8xf32>
      %62 = tpu.matmul %57, %59, %cst_44 {dimension_numbers = #tpu.dot_dimension_numbers<[1], [1], [0], [0], [0, 0, 1, 0], [], []>} : vector<8x8xbf16>, vector<8x8xbf16>, vector<8x8xf32> -> vector<8x8xf32>
      %cst_45 = arith.constant 0.353553385 : f32
      %63 = vector.broadcast %cst_45 : f32 to vector<8x8xf32>
      %64 = arith.mulf %62, %63 : vector<8x8xf32>
      %cst_46 = arith.constant dense<0xFF800000> : vector<8xf32>
      %65 = vector.multi_reduction <maximumf>, %64, %cst_46 [1] : vector<8x8xf32> to vector<8xf32>
      %66 = vector.shape_cast %65 : vector<8xf32> to vector<8x1xf32>
      %67 = vector.broadcast %66 : vector<8x1xf32> to vector<8x8xf32>
      %68 = arith.subf %64, %67 : vector<8x8xf32>
      %69 = math.exp %68 : vector<8x8xf32>
      %cst_47 = arith.constant dense<0.000000e+00> : vector<8xf32>
      %70 = vector.multi_reduction <add>, %69, %cst_47 [1] : vector<8x8xf32> to vector<8xf32>
      %71 = vector.shape_cast %70 : vector<8xf32> to vector<8x1xf32>
      %72 = tpu.reciprocal %71 {approx = true} : vector<8x1xf32> -> vector<8x1xf32>
      %73 = vector.broadcast %72 : vector<8x1xf32> to vector<8x8xf32>
      %74 = arith.mulf %69, %73 : vector<8x8xf32>
      %75 = arith.truncf %74 : vector<8x8xf32> to vector<8x8xbf16>
      %cst_48 = arith.constant dense<0.000000e+00> : vector<8x8xf32>
      %76 = tpu.matmul %75, %61, %cst_48 {dimension_numbers = #tpu.dot_dimension_numbers<[1], [0], [0], [1], [0, 0, 1, 1], [], []>} : vector<8x8xbf16>, vector<8x8xbf16>, vector<8x8xf32> -> vector<8x8xf32>
      %c0_49 = arith.constant 0 : index
      %c0_50 = arith.constant 0 : index
      %c16 = arith.constant 16 : index
      %77 = vector.load %arg4[%c0_49, %c0_50, %c16] : memref<1x8x32xbf16, #tpu.memory_space<vmem>>, vector<1x8x8xbf16>
      %78 = vector.shape_cast %77 : vector<1x8x8xbf16> to vector<8x8xbf16>
      %c0_51 = arith.constant 0 : index
      %c0_52 = arith.constant 0 : index
      %c16_53 = arith.constant 16 : index
      %79 = vector.load %arg5[%c0_51, %c0_52, %c16_53] : memref<1x8x32xbf16, #tpu.memory_space<vmem>>, vector<1x8x8xbf16>
      %80 = vector.shape_cast %79 : vector<1x8x8xbf16> to vector<8x8xbf16>
      %c0_54 = arith.constant 0 : index
      %c0_55 = arith.constant 0 : index
      %c16_56 = arith.constant 16 : index
      %81 = vector.load %arg6[%c0_54, %c0_55, %c16_56] : memref<1x8x32xbf16, #tpu.memory_space<vmem>>, vector<1x8x8xbf16>
      %82 = vector.shape_cast %81 : vector<1x8x8xbf16> to vector<8x8xbf16>
      %cst_57 = arith.constant dense<0.000000e+00> : vector<8x8xf32>
      %83 = tpu.matmul %78, %80, %cst_57 {dimension_numbers = #tpu.dot_dimension_numbers<[1], [1], [0], [0], [0, 0, 1, 0], [], []>} : vector<8x8xbf16>, vector<8x8xbf16>, vector<8x8xf32> -> vector<8x8xf32>
      %cst_58 = arith.constant 0.353553385 : f32
      %84 = vector.broadcast %cst_58 : f32 to vector<8x8xf32>
      %85 = arith.mulf %83, %84 : vector<8x8xf32>
      %cst_59 = arith.constant dense<0xFF800000> : vector<8xf32>
      %86 = vector.multi_reduction <maximumf>, %85, %cst_59 [1] : vector<8x8xf32> to vector<8xf32>
      %87 = vector.shape_cast %86 : vector<8xf32> to vector<8x1xf32>
      %88 = vector.broadcast %87 : vector<8x1xf32> to vector<8x8xf32>
      %89 = arith.subf %85, %88 : vector<8x8xf32>
      %90 = math.exp %89 : vector<8x8xf32>
      %cst_60 = arith.constant dense<0.000000e+00> : vector<8xf32>
      %91 = vector.multi_reduction <add>, %90, %cst_60 [1] : vector<8x8xf32> to vector<8xf32>
      %92 = vector.shape_cast %91 : vector<8xf32> to vector<8x1xf32>
      %93 = tpu.reciprocal %92 {approx = true} : vector<8x1xf32> -> vector<8x1xf32>
      %94 = vector.broadcast %93 : vector<8x1xf32> to vector<8x8xf32>
      %95 = arith.mulf %90, %94 : vector<8x8xf32>
      %96 = arith.truncf %95 : vector<8x8xf32> to vector<8x8xbf16>
      %cst_61 = arith.constant dense<0.000000e+00> : vector<8x8xf32>
      %97 = tpu.matmul %96, %82, %cst_61 {dimension_numbers = #tpu.dot_dimension_numbers<[1], [0], [0], [1], [0, 0, 1, 1], [], []>} : vector<8x8xbf16>, vector<8x8xbf16>, vector<8x8xf32> -> vector<8x8xf32>
      %c0_62 = arith.constant 0 : index
      %c0_63 = arith.constant 0 : index
      %c24 = arith.constant 24 : index
      %98 = vector.load %arg4[%c0_62, %c0_63, %c24] : memref<1x8x32xbf16, #tpu.memory_space<vmem>>, vector<1x8x8xbf16>
      %99 = vector.shape_cast %98 : vector<1x8x8xbf16> to vector<8x8xbf16>
      %c0_64 = arith.constant 0 : index
      %c0_65 = arith.constant 0 : index
      %c24_66 = arith.constant 24 : index
      %100 = vector.load %arg5[%c0_64, %c0_65, %c24_66] : memref<1x8x32xbf16, #tpu.memory_space<vmem>>, vector<1x8x8xbf16>
      %101 = vector.shape_cast %100 : vector<1x8x8xbf16> to vector<8x8xbf16>
      %c0_67 = arith.constant 0 : index
      %c0_68 = arith.constant 0 : index
      %c24_69 = arith.constant 24 : index
      %102 = vector.load %arg6[%c0_67, %c0_68, %c24_69] : memref<1x8x32xbf16, #tpu.memory_space<vmem>>, vector<1x8x8xbf16>
      %103 = vector.shape_cast %102 : vector<1x8x8xbf16> to vector<8x8xbf16>
      %cst_70 = arith.constant dense<0.000000e+00> : vector<8x8xf32>
      %104 = tpu.matmul %99, %101, %cst_70 {dimension_numbers = #tpu.dot_dimension_numbers<[1], [1], [0], [0], [0, 0, 1, 0], [], []>} : vector<8x8xbf16>, vector<8x8xbf16>, vector<8x8xf32> -> vector<8x8xf32>
      %cst_71 = arith.constant 0.353553385 : f32
      %105 = vector.broadcast %cst_71 : f32 to vector<8x8xf32>
      %106 = arith.mulf %104, %105 : vector<8x8xf32>
      %cst_72 = arith.constant dense<0xFF800000> : vector<8xf32>
      %107 = vector.multi_reduction <maximumf>, %106, %cst_72 [1] : vector<8x8xf32> to vector<8xf32>
      %108 = vector.shape_cast %107 : vector<8xf32> to vector<8x1xf32>
      %109 = vector.broadcast %108 : vector<8x1xf32> to vector<8x8xf32>
      %110 = arith.subf %106, %109 : vector<8x8xf32>
      %111 = math.exp %110 : vector<8x8xf32>
      %cst_73 = arith.constant dense<0.000000e+00> : vector<8xf32>
      %112 = vector.multi_reduction <add>, %111, %cst_73 [1] : vector<8x8xf32> to vector<8xf32>
      %113 = vector.shape_cast %112 : vector<8xf32> to vector<8x1xf32>
      %114 = tpu.reciprocal %113 {approx = true} : vector<8x1xf32> -> vector<8x1xf32>
      %115 = vector.broadcast %114 : vector<8x1xf32> to vector<8x8xf32>
      %116 = arith.mulf %111, %115 : vector<8x8xf32>
      %117 = arith.truncf %116 : vector<8x8xf32> to vector<8x8xbf16>
      %cst_74 = arith.constant dense<0.000000e+00> : vector<8x8xf32>
      %118 = tpu.matmul %117, %103, %cst_74 {dimension_numbers = #tpu.dot_dimension_numbers<[1], [0], [0], [1], [0, 0, 1, 1], [], []>} : vector<8x8xbf16>, vector<8x8xbf16>, vector<8x8xf32> -> vector<8x8xf32>
      %119 = tpu.concatenate %55, %76, %97, %118 in 1 : vector<8x8xf32>, vector<8x8xf32>, vector<8x8xf32>, vector<8x8xf32> -> vector<8x32xf32>
      %120 = arith.truncf %119 : vector<8x32xf32> to vector<8x32xbf16>
      %c0_75 = arith.constant 0 : index
      %c0_76 = arith.constant 0 : index
      %121 = vector.load %arg7[%c0_75, %c0_76] : memref<32x32xbf16, #tpu.memory_space<vmem>>, vector<32x32xbf16>
      %cst_77 = arith.constant dense<0.000000e+00> : vector<8x32xf32>
      %122 = tpu.matmul %120, %121, %cst_77 {dimension_numbers = #tpu.dot_dimension_numbers<[1], [0], [0], [1], [0, 0, 1, 1], [], []>} : vector<8x32xbf16>, vector<32x32xbf16>, vector<8x32xf32> -> vector<8x32xf32>
      %c0_78 = arith.constant 0 : index
      %c0_79 = arith.constant 0 : index
      %123 = vector.load %arg8[%c0_78, %c0_79] : memref<1x32xf32, #tpu.memory_space<vmem>>, vector<1x32xf32>
      %124 = vector.shape_cast %123 : vector<1x32xf32> to vector<32xf32>
      %125 = vector.shape_cast %124 : vector<32xf32> to vector<1x32xf32>
      %126 = vector.broadcast %125 : vector<1x32xf32> to vector<8x32xf32>
      %127 = arith.addf %122, %126 : vector<8x32xf32>
      %c0_80 = arith.constant 0 : index
      %c0_81 = arith.constant 0 : index
      %128 = vector.load %arg9[%c0_80, %c0_81] : memref<1x32xf32, #tpu.memory_space<vmem>>, vector<1x32xf32>
      %129 = vector.shape_cast %128 : vector<1x32xf32> to vector<32xf32>
      %130 = vector.shape_cast %129 : vector<32xf32> to vector<1x32xf32>
      %131 = vector.broadcast %130 : vector<1x32xf32> to vector<8x32xf32>
      %132 = arith.mulf %127, %131 : vector<8x32xf32>
      %133 = arith.addf %34, %132 : vector<8x32xf32>
      %c0_82 = arith.constant 0 : index
      %c0_83 = arith.constant 0 : index
      %134 = vector.load %arg18[%c0_82, %c0_83] : memref<8x32xf32, #tpu.memory_space<vmem>>, vector<8x32xf32>
      tpu.vector_store %arg18[%c0_82, %c0_83], %133 {strides = array<i32>} : memref<8x32xf32, #tpu.memory_space<vmem>>, vector<8x32xf32>,
      %cst_84 = arith.constant dense<0.000000e+00> : vector<8xf32>
      %135 = vector.multi_reduction <add>, %133, %cst_84 [1] : vector<8x32xf32> to vector<8xf32>
      %136 = vector.shape_cast %135 : vector<8xf32> to vector<8x1xf32>
      %cst_85 = arith.constant 3.200000e+01 : f32
      %137 = vector.broadcast %cst_85 : f32 to vector<8x1xf32>
      %138 = arith.divf %136, %137 : vector<8x1xf32>
      %139 = vector.broadcast %138 : vector<8x1xf32> to vector<8x32xf32>
      %140 = arith.subf %133, %139 : vector<8x32xf32>
      %141 = arith.mulf %140, %140 : vector<8x32xf32>
      %cst_86 = arith.constant dense<0.000000e+00> : vector<8xf32>
      %142 = vector.multi_reduction <add>, %141, %cst_86 [1] : vector<8x32xf32> to vector<8xf32>
      %143 = vector.shape_cast %142 : vector<8xf32> to vector<8x1xf32>
      %cst_87 = arith.constant 3.200000e+01 : f32
      %144 = vector.broadcast %cst_87 : f32 to vector<8x1xf32>
      %145 = arith.divf %143, %144 : vector<8x1xf32>
      %146 = vector.broadcast %138 : vector<8x1xf32> to vector<8x32xf32>
      %147 = arith.subf %133, %146 : vector<8x32xf32>
      %cst_88 = arith.constant 9.99999997E-7 : f32
      %148 = vector.broadcast %cst_88 : f32 to vector<8x1xf32>
      %149 = arith.addf %145, %148 : vector<8x1xf32>
      %150 = math.rsqrt %149 : vector<8x1xf32>
      %151 = vector.broadcast %150 : vector<8x1xf32> to vector<8x32xf32>
      %152 = arith.mulf %147, %151 : vector<8x32xf32>
      %c0_89 = arith.constant 0 : index
      %c0_90 = arith.constant 0 : index
      %153 = vector.load %arg10[%c0_89, %c0_90] : memref<1x32xf32, #tpu.memory_space<vmem>>, vector<1x32xf32>
      %154 = vector.shape_cast %153 : vector<1x32xf32> to vector<32xf32>
      %155 = vector.shape_cast %154 : vector<32xf32> to vector<1x32xf32>
      %156 = vector.broadcast %155 : vector<1x32xf32> to vector<8x32xf32>
      %157 = arith.mulf %152, %156 : vector<8x32xf32>
      %c0_91 = arith.constant 0 : index
      %c0_92 = arith.constant 0 : index
      %158 = vector.load %arg11[%c0_91, %c0_92] : memref<1x32xf32, #tpu.memory_space<vmem>>, vector<1x32xf32>
      %159 = vector.shape_cast %158 : vector<1x32xf32> to vector<32xf32>
      %160 = vector.shape_cast %159 : vector<32xf32> to vector<1x32xf32>
      %161 = vector.broadcast %160 : vector<1x32xf32> to vector<8x32xf32>
      %162 = arith.addf %157, %161 : vector<8x32xf32>
      %163 = arith.truncf %162 : vector<8x32xf32> to vector<8x32xbf16>
      %c0_93 = arith.constant 0 : index
      %c0_94 = arith.constant 0 : index
      %164 = vector.load %arg19[%c0_93, %c0_94] : memref<8x32xbf16, #tpu.memory_space<vmem>>, vector<8x32xbf16>
      tpu.vector_store %arg19[%c0_93, %c0_94], %163 {strides = array<i32>} : memref<8x32xbf16, #tpu.memory_space<vmem>>, vector<8x32xbf16>,
      %cst_95 = arith.constant 0.000000e+00 : f32
      %165 = vector.broadcast %cst_95 : f32 to vector<8x32xf32>
      %c0_96 = arith.constant 0 : index
      %c0_97 = arith.constant 0 : index
      %166 = vector.load %arg20[%c0_96, %c0_97] : memref<8x32xf32, #tpu.memory_space<vmem>>, vector<8x32xf32>
      tpu.vector_store %arg20[%c0_96, %c0_97], %165 {strides = array<i32>} : memref<8x32xf32, #tpu.memory_space<vmem>>, vector<8x32xf32>,
    } else {
    }
    %c0 = arith.constant 0 : index
    %c0_1 = arith.constant 0 : index
    %3 = vector.load %arg19[%c0, %c0_1] : memref<8x32xbf16, #tpu.memory_space<vmem>>, vector<8x32xbf16>
    %c0_2 = arith.constant 0 : index
    %c0_3 = arith.constant 0 : index
    %4 = vector.load %arg12[%c0_2, %c0_3] : memref<32x128xbf16, #tpu.memory_space<vmem>>, vector<32x128xbf16>
    %cst = arith.constant dense<0.000000e+00> : vector<8x128xf32>
    %5 = tpu.matmul %3, %4, %cst {dimension_numbers = #tpu.dot_dimension_numbers<[1], [0], [0], [1], [0, 0, 1, 1], [], []>} : vector<8x32xbf16>, vector<32x128xbf16>, vector<8x128xf32> -> vector<8x128xf32>
    %c0_4 = arith.constant 0 : index
    %c0_5 = arith.constant 0 : index
    %6 = vector.load %arg13[%c0_4, %c0_5] : memref<1x128xf32, #tpu.memory_space<vmem>>, vector<1x128xf32>
    %7 = vector.shape_cast %6 : vector<1x128xf32> to vector<128xf32>
    %8 = vector.shape_cast %7 : vector<128xf32> to vector<1x128xf32>
    %9 = vector.broadcast %8 : vector<1x128xf32> to vector<8x128xf32>
    %10 = arith.addf %5, %9 : vector<8x128xf32>
    %11 = arith.mulf %10, %10 : vector<8x128xf32>
    %12 = arith.mulf %10, %11 : vector<8x128xf32>
    %cst_6 = arith.constant 4.471500e-02 : f32
    %13 = vector.broadcast %cst_6 : f32 to vector<8x128xf32>
    %14 = arith.mulf %13, %12 : vector<8x128xf32>
    %15 = arith.addf %10, %14 : vector<8x128xf32>
    %cst_7 = arith.constant 0.797884583 : f32
    %16 = vector.broadcast %cst_7 : f32 to vector<8x128xf32>
    %17 = arith.mulf %16, %15 : vector<8x128xf32>
    %18 = math.tanh %17 : vector<8x128xf32>
    %cst_8 = arith.constant 1.000000e+00 : f32
    %19 = vector.broadcast %cst_8 : f32 to vector<8x128xf32>
    %20 = arith.addf %19, %18 : vector<8x128xf32>
    %cst_9 = arith.constant 5.000000e-01 : f32
    %21 = vector.broadcast %cst_9 : f32 to vector<8x128xf32>
    %22 = arith.mulf %21, %20 : vector<8x128xf32>
    %23 = arith.mulf %10, %22 : vector<8x128xf32>
    %c0_10 = arith.constant 0 : index
    %c0_11 = arith.constant 0 : index
    %24 = vector.load %arg20[%c0_10, %c0_11] : memref<8x32xf32, #tpu.memory_space<vmem>>, vector<8x32xf32>
    %25 = arith.truncf %23 : vector<8x128xf32> to vector<8x128xbf16>
    %c0_12 = arith.constant 0 : index
    %c0_13 = arith.constant 0 : index
    %26 = vector.load %arg14[%c0_12, %c0_13] : memref<128x32xbf16, #tpu.memory_space<vmem>>, vector<128x32xbf16>
    %cst_14 = arith.constant dense<0.000000e+00> : vector<8x32xf32>
    %27 = tpu.matmul %25, %26, %cst_14 {dimension_numbers = #tpu.dot_dimension_numbers<[1], [0], [0], [1], [0, 0, 1, 1], [], []>} : vector<8x128xbf16>, vector<128x32xbf16>, vector<8x32xf32> -> vector<8x32xf32>
    %28 = arith.addf %24, %27 : vector<8x32xf32>
    %c0_15 = arith.constant 0 : index
    %c0_16 = arith.constant 0 : index
    %29 = vector.load %arg20[%c0_15, %c0_16] : memref<8x32xf32, #tpu.memory_space<vmem>>, vector<8x32xf32>
    tpu.vector_store %arg20[%c0_15, %c0_16], %28 {strides = array<i32>} : memref<8x32xf32, #tpu.memory_space<vmem>>, vector<8x32xf32>,
    %c0_i32_17 = arith.constant 0 : i32
    %30 = arith.cmpi eq, %arg2, %c0_i32_17 : i32
    %31 = arith.extui %30 : i1 to i32
    %c0_i32_18 = arith.constant 0 : i32
    %32 = arith.cmpi ne, %31, %c0_i32_18 : i32
    scf.if %32 {
      %c0_19 = arith.constant 0 : index
      %c0_20 = arith.constant 0 : index
      %33 = vector.load %arg18[%c0_19, %c0_20] : memref<8x32xf32, #tpu.memory_space<vmem>>, vector<8x32xf32>
      %c0_21 = arith.constant 0 : index
      %c0_22 = arith.constant 0 : index
      %34 = vector.load %arg20[%c0_21, %c0_22] : memref<8x32xf32, #tpu.memory_space<vmem>>, vector<8x32xf32>
      %c0_23 = arith.constant 0 : index
      %c0_24 = arith.constant 0 : index
      %35 = vector.load %arg15[%c0_23, %c0_24] : memref<1x32xf32, #tpu.memory_space<vmem>>, vector<1x32xf32>
      %36 = vector.shape_cast %35 : vector<1x32xf32> to vector<32xf32>
      %37 = vector.shape_cast %36 : vector<32xf32> to vector<1x32xf32>
      %38 = vector.broadcast %37 : vector<1x32xf32> to vector<8x32xf32>
      %39 = arith.addf %34, %38 : vector<8x32xf32>
      %c0_25 = arith.constant 0 : index
      %c0_26 = arith.constant 0 : index
      %40 = vector.load %arg16[%c0_25, %c0_26] : memref<1x32xf32, #tpu.memory_space<vmem>>, vector<1x32xf32>
      %41 = vector.shape_cast %40 : vector<1x32xf32> to vector<32xf32>
      %42 = vector.shape_cast %41 : vector<32xf32> to vector<1x32xf32>
      %43 = vector.broadcast %42 : vector<1x32xf32> to vector<8x32xf32>
      %44 = arith.mulf %39, %43 : vector<8x32xf32>
      %45 = arith.addf %33, %44 : vector<8x32xf32>
      %c0_27 = arith.constant 0 : index
      %c0_28 = arith.constant 0 : index
      %c0_29 = arith.constant 0 : index
      %46 = vector.load %arg17[%c0_27, %c0_28, %c0_29] : memref<1x8x32xf32, #tpu.memory_space<vmem>>, vector<1x8x32xf32>
      %47 = vector.shape_cast %46 : vector<1x8x32xf32> to vector<8x32xf32>
      %48 = vector.shape_cast %45 : vector<8x32xf32> to vector<1x8x32xf32>
      tpu.vector_store %arg17[%c0_27, %c0_28, %c0_29], %48 {strides = array<i32>} : memref<1x8x32xf32, #tpu.memory_space<vmem>>, vector<1x8x32xf32>,
    } else {
    }
    return
  }
  func.func @transform_0(%arg0: i32, %arg1: i32, %arg2: i32) -> (i32, i32, i32) {
    %c0_i32 = arith.constant 0 : i32
    %c0_i32_0 = arith.constant 0 : i32
    return %arg0, %arg1, %c0_i32 : i32, i32, i32
  }
  func.func @transform_1(%arg0: i32, %arg1: i32, %arg2: i32) -> (i32, i32, i32) {
    %c0_i32 = arith.constant 0 : i32
    %c0_i32_0 = arith.constant 0 : i32
    return %arg0, %arg1, %c0_i32 : i32, i32, i32
  }
  func.func @transform_2(%arg0: i32, %arg1: i32, %arg2: i32) -> (i32, i32, i32) {
    %c0_i32 = arith.constant 0 : i32
    %c0_i32_0 = arith.constant 0 : i32
    %c0_i32_1 = arith.constant 0 : i32
    return %arg0, %c0_i32, %c0_i32_0 : i32, i32, i32
  }
  func.func @transform_3(%arg0: i32, %arg1: i32, %arg2: i32) -> (i32, i32, i32) {
    %c0_i32 = arith.constant 0 : i32
    %c0_i32_0 = arith.constant 0 : i32
    %c0_i32_1 = arith.constant 0 : i32
    return %arg0, %c0_i32, %c0_i32_0 : i32, i32, i32
  }
  func.func @transform_4(%arg0: i32, %arg1: i32, %arg2: i32) -> (i32, i32) {
    %c0_i32 = arith.constant 0 : i32
    %c0_i32_0 = arith.constant 0 : i32
    %c0_i32_1 = arith.constant 0 : i32
    return %c0_i32, %c0_i32_0 : i32, i32
  }
  func.func @transform_5(%arg0: i32, %arg1: i32, %arg2: i32) -> (i32, i32) {
    %c0_i32 = arith.constant 0 : i32
    %c0_i32_0 = arith.constant 0 : i32
    %c0_i32_1 = arith.constant 0 : i32
    return %c0_i32, %c0_i32_0 : i32, i32
  }
  func.func @transform_6(%arg0: i32, %arg1: i32, %arg2: i32) -> (i32, i32) {
    %c0_i32 = arith.constant 0 : i32
    %c0_i32_0 = arith.constant 0 : i32
    %c0_i32_1 = arith.constant 0 : i32
    return %c0_i32, %c0_i32_0 : i32, i32
  }
  func.func @transform_7(%arg0: i32, %arg1: i32, %arg2: i32) -> (i32, i32) {
    %c0_i32 = arith.constant 0 : i32
    %c0_i32_0 = arith.constant 0 : i32
    %c0_i32_1 = arith.constant 0 : i32
    return %c0_i32, %c0_i32_0 : i32, i32
  }
  func.func @transform_8(%arg0: i32, %arg1: i32, %arg2: i32) -> (i32, i32) {
    %c0_i32 = arith.constant 0 : i32
    %c0_i32_0 = arith.constant 0 : i32
    %c0_i32_1 = arith.constant 0 : i32
    return %c0_i32, %c0_i32_0 : i32, i32
  }
  func.func @transform_9(%arg0: i32, %arg1: i32, %arg2: i32) -> (i32, i32) {
    %c0_i32 = arith.constant 0 : i32
    %c0_i32_0 = arith.constant 0 : i32
    return %c0_i32, %arg2 : i32, i32
  }
  func.func @transform_10(%arg0: i32, %arg1: i32, %arg2: i32) -> (i32, i32) {
    %c0_i32 = arith.constant 0 : i32
    %c0_i32_0 = arith.constant 0 : i32
    return %c0_i32, %arg2 : i32, i32
  }
  func.func @transform_11(%arg0: i32, %arg1: i32, %arg2: i32) -> (i32, i32) {
    %c0_i32 = arith.constant 0 : i32
    %c0_i32_0 = arith.constant 0 : i32
    return %arg2, %c0_i32 : i32, i32
  }
  func.func @transform_12(%arg0: i32, %arg1: i32, %arg2: i32) -> (i32, i32) {
    %c0_i32 = arith.constant 0 : i32
    %c0_i32_0 = arith.constant 0 : i32
    %c0_i32_1 = arith.constant 0 : i32
    return %c0_i32, %c0_i32_0 : i32, i32
  }
  func.func @transform_13(%arg0: i32, %arg1: i32, %arg2: i32) -> (i32, i32) {
    %c0_i32 = arith.constant 0 : i32
    %c0_i32_0 = arith.constant 0 : i32
    %c0_i32_1 = arith.constant 0 : i32
    return %c0_i32, %c0_i32_0 : i32, i32
  }
  func.func @transform_14(%arg0: i32, %arg1: i32, %arg2: i32) -> (i32, i32, i32) {
    %c0_i32 = arith.constant 0 : i32
    %c0_i32_0 = arith.constant 0 : i32
    return %arg0, %arg1, %c0_i32 : i32, i32, i32
  }
}

</mosaic_0001>

<bundles_post_ra>
// kernel: transformer_stage.6
= control target key start
LH: loop header
LB: loop body
LE: loop exit
PB: predicated region body
PF: predicated region fallthrough
CT: control target
= control target key end

     0   :  { %s742_s24 = smov 0   ;;  %s744_s25 = smov 0   ;;  %s803_s0 = inlined_call_operand.vmem [shape: f32[2,8,32], index: 0, kind: input, shape index: {}]   ;;  %s804_s1 = inlined_call_operand.vmem [shape: f32[1,32], index: 1, kind: input, shape index: {}]   ;;  %s805_s2 = inlined_call_operand.vmem [shape: f32[1,32], index: 2, kind: input, shape index: {}]   ;;  %s806_s3 = inlined_call_operand.vmem [shape: bf16[32,96], index: 3, kind: input, shape index: {}]   ;;  %s807_s4 = inlined_call_operand.vmem [shape: f32[1,96], index: 4, kind: input, shape index: {}]   ;;  %s808_s5 = inlined_call_operand.vmem [shape: bf16[2,8,32], index: 5, kind: output, shape index: {0}]   ;;  %s809_s6 = inlined_call_operand.vmem [shape: bf16[2,8,32], index: 6, kind: output, shape index: {1}]   ;;  %s810_s7 = inlined_call_operand.vmem [shape: bf16[2,8,32], index: 7, kind: output, shape index: {2}]  }
   0x1   :  { %s746_s26 = smov 0  }
   0x2 LB: > { %s30_s27 = sadd.s32 1, %s692_s25  ;;  %p616_p0 = scmp.ge.s32.totalorder %s696_s26, 1  ;;  %s696_s26 = sphi %s746_s26, %s18_s26   ;;  %s692_s25 = sphi %s744_s25, %s812_s25   ;;  %s688_s24 = sphi %s742_s24, %s811_s24  }
   0x3   : > { %p32_p1 = scmp.ge.s32.totalorder %s30_s27, 2  ;;  %p264_p2 = scmp.lt.s32.totalorder %s696_s26, 3 }
   0x5   : > { %s814_s27 = smov (%p32_p1, %s30_s27), 0  ;;  %p265_p3 = pnand %p616_p0, %p264_p2 }
   0x6   : > { %p314_p4 = scmp.lt.s32.totalorder (!%p265_p3), %s688_s24, 1  ;;  %vm344_vm0 = vcmask (!%p265_p3), 261120   ;;  %v670_v7 = vld [vmem:[%s806_s3] sm:$0xff] (!%p265_p3)   ;;  %v698_v8 = vmov (!%p265_p3), 0.0   ;;  %v671_v9 = vld [vmem:[%s806_s3 + $0x8] sm:$0xff] (!%p265_p3)   ;;  %vm699_vm1 = vmmov (!%p265_p3), 0  }
   0x7   : > { %268 = sbr.rel (%p265_p3) target bundleno = 669 (0x29d), region = 40  ;;  %634 = vmatprep.subr.bf16.mxu0 (!%p265_p3), %v698_v8  ;;  %638 = vmatprep.mubr.msk.bf16.mxu0 (!%p265_p3), %vm699_vm1, %v698_v8  ;;  %v621_v14 = vld [vmem:[%s804_s1] ss:$0 sm:$0xff] (!%p265_p3)  ;;  %vm443_vm2 = vcmask (!%p265_p3), 257024   ;;  %s700_s23 = smov (!%p265_p3), 96  }
   0x8   : > { %635 = vmatpush3.bf16.msra.mxu0 (!%p265_p3), %v670_v7  ;;  %v622_v16 = vld [vmem:[%s805_s2] ss:$0 sm:$0xff] (!%p265_p3) }
   0x9   : > { %636 = vmatprep.subr.bf16.mxu0 (!%p265_p3), %v698_v8  ;;  %v623_v20 = vld [vmem:[%s807_s4] ss:$0 sm:$0xff] (!%p265_p3) }
   0xc   : > { %637 = vmatpush3.bf16.msra.mxu0 (!%p265_p3), %v671_v9 }
   0xe   : > { %s816_s24 = smov (!%p314_p4, %s688_s24), 1 }
   0xf   : > { %s617_s28 = sshll.u32 %s816_s24, 3  ;;  %s618_s19 = sshll.u32 %s816_s24, 2 }
  0x10   : > { %s320_s8 = scalar_lea.vmem %s803_s0, %s617_s28  ;;  %s327_s22 = scalar_lea.vmem %s808_s5, %s618_s19 }
  0x11   : > { %v343_v0 = vld [vmem:[%s320_s8] sm:$0xff]  ;;  %s701_s28 = smov 64   ;;  %s334_s24 = scalar_lea.vmem %s809_s6, %s618_s19 }
  0x12   : > { %v345_v1 = vsel %vm344_vm0, %v343_v0, 0.0  ;;  %s341_s10 = scalar_lea.vmem %s810_s7, %s618_s19 }
  0x13   : > { %346 = vadd.xlane.f32.xlu0 %v345_v1 }
  0xa0   : > { %v347_v2 = vpop.xlane.xlu0 %346 }
  0xa1   : > { %v349_v3 = vmul.f32 0.03125, %v347_v2 }
  0xa3   : > { %v350_v4 = vsub.f32 %v343_v0, %v349_v3 }
  0xa5   : > { %v351_v5 = vmul.f32 %v350_v4, %v350_v4 }
  0xa7   : > { %v352_v6 = vsel %vm344_vm0, %v351_v5, 0.0 }
  0xa8   : > { %353 = vadd.xlane.f32.xlu0 %v352_v6 }
 0x135   : > { %v354_v10 = vpop.xlane.xlu0 %353 }
 0x136   : > { %v355_v11 = vmul.f32 0.03125, %v354_v10 }
 0x138   : > { %v356_v12 = vadd.f32 1e-06, %v355_v11 }
 0x13a   : > { %672 = vrsqrt.f32 %v356_v12 }
 0x144   : > { %v673_v13 = vpop.eup %672 }
 0x145   : > { %v358_v15 = vmul.f32 %v673_v13, %v350_v4 }
 0x147   : > { %v366_v17 = vmul.f32 %v621_v14, %v358_v15 }
 0x149   : > { %v374_v18 = vadd.f32 %v622_v16, %v366_v17 }
 0x14b   : > { %v375_v19 = vpack.c.bf16 %v374_v18, %v374_v18 }
 0x14d   : > { %639 = vmatmul.mubr.msk.bf16.vlgmr.msra.gmra.mrb[0].mxu0 %vm344_vm0, %v375_v19 }
 0x220   : > { %v436_v21 = vpop.f32.mrb[0].mxu0 }
 0x221   : > { %v437_v22 = vadd.f32 %v623_v20, %v436_v21  ;;  %v640_v23 = vpop.f32.mrb[1].mxu0 }
 0x222   : > { %v439_v24 = vpop.f32.mrb[2].mxu0 }
 0x223   : > { %v442_v25 = vpack.c.bf16 %v437_v22, %v437_v22  ;;  %v641_v26 = vpop.f32.mrb[3].mxu0 }
 0x225   : > { %448 = vrot.lane.b32.xlu1 %v442_v25, %s700_s23  ;;  %444 = vst.msk [vmem:[%s327_s22] sm:$0xf] %vm443_vm2, %v442_v25 }
 0x229   : > { %452 = vrot.lane.b32.xlu1 %v442_v25, %s701_s28 }
 0x297   : > { %v449_v27 = vpop.permute.xlu1 %448 }
 0x298   : > { %451 = vst.msk [vmem:[%s334_s24] sm:$0xf] %vm443_vm2, %v449_v27 }
 0x29b   : > { %v453_v28 = vpop.permute.xlu1 %452 }
 0x29c   : > { %455 = vst.msk [vmem:[%s341_s10] sm:$0xf] %vm443_vm2, %v453_v28 }
 0x29d PF: > { %s18_s26 = sadd.s32 1, %s696_s26   ;;  %s811_s24 = smov %s692_s25 }
 0x29e   : > { %p15_p5 = scmp.ge.s32.totalorder %s18_s26, 4   ;;  %s812_s25 = smov %s814_s27 }
 0x2a0   :  { %17 = sbr.rel (!%p15_p5) target bundleno = 2 (0x2), region = 94 }

// kernel: transformer_stage.7
= control target key start
LH: loop header
LB: loop body
LE: loop exit
PB: predicated region body
PF: predicated region fallthrough
CT: control target
= control target key end

     0   :  { %s1906_s29 = smov 0   ;;  %s1908_s30 = smov 0   ;;  %s2111_s0 = inlined_call_operand.vmem [shape: f32[2,8,32], index: 0, kind: input, shape index: {}]   ;;  %s2112_s1 = inlined_call_operand.vmem [shape: bf16[2,8,32], index: 1, kind: input, shape index: {}]   ;;  %s2113_s2 = inlined_call_operand.vmem [shape: bf16[2,8,32], index: 2, kind: input, shape index: {}]   ;;  %s2114_s3 = inlined_call_operand.vmem [shape: bf16[2,8,32], index: 3, kind: input, shape index: {}]   ;;  %s2115_s4 = inlined_call_operand.vmem [shape: bf16[32,32], index: 4, kind: input, shape index: {}]   ;;  %s2116_s5 = inlined_call_operand.vmem [shape: f32[1,32], index: 5, kind: input, shape index: {}]   ;;  %s2117_s6 = inlined_call_operand.vmem [shape: f32[1,32], index: 6, kind: input, shape index: {}]   ;;  %s2118_s7 = inlined_call_operand.vmem [shape: f32[1,32], index: 7, kind: input, shape index: {}]   ;;  %s2119_s8 = inlined_call_operand.vmem [shape: f32[1,32], index: 8, kind: input, shape index: {}]   ;;  %s2120_s9 = inlined_call_operand.vmem [shape: bf16[32,128], index: 9, kind: input, shape index: {}]   ;;  %s2121_s10 = inlined_call_operand.vmem [shape: f32[1,128], index: 10, kind: input, shape index: {}]   ;;  %s2122_s11 = inlined_call_operand.vmem [shape: bf16[128,32], index: 11, kind: input, shape index: {}]   ;;  %s2123_s12 = inlined_call_operand.vmem [shape: f32[1,32], index: 12, kind: input, shape index: {}]   ;;  %s2124_s13 = inlined_call_operand.vmem [shape: f32[1,32], index: 13, kind: input, shape index: {}]   ;;  %s2125_s14 = inlined_call_operand.vmem [shape: f32[2,8,32], index: 14, kind: output, shape index: {}]  }
   0x1   :  { %s1910_s15 = smov 0  }
   0x2 LB: > { %s43_s16 = sadd.s32 1, %s1817_s30  ;;  %p1577_p0 = scmp.ge.s32.totalorder %s1821_s15, 1  ;;  %s1821_s15 = sphi %s1910_s15, %s24_s15   ;;  %s1817_s30 = sphi %s1908_s30, %s2127_s30   ;;  %s1813_s29 = sphi %s1906_s29, %s2126_s29  }
   0x3   : > { %p45_p1 = scmp.ge.s32.totalorder %s43_s16, 2  ;;  %p497_p2 = scmp.lt.s32.totalorder %s1821_s15, 3 }
   0x5   : > { %s2129_s16 = smov (%p45_p1, %s43_s16), 0  ;;  %p498_p3 = pnand %p1577_p0, %p497_p2 }
   0x6   : > { %p574_p4 = scmp.lt.s32.totalorder (!%p498_p3), %s1813_s29, 1  ;;  %v1823_v0 = vmov (!%p498_p3), 0.0   ;;  %vm1824_vm0 = vmmov (!%p498_p3), 0   ;;  %vm625_vm1 = vcmask (!%p498_p3), 64512   ;;  %s1825_s24 = smov (!%p498_p3), 120   ;;  %vm688_vm2 = vcmask (!%p498_p3), 1043456  }
   0x7   : > { %501 = sbr.rel (%p498_p3) target bundleno = 2461 (0x99d), region = 76  ;;  %1648 = vmatprep.subr.bf16.mxu0 (!%p498_p3), %v1823_v0  ;;  %1650 = vmatprep.mubr.msk.bf16.mxu0 (!%p498_p3), %vm1824_vm0, %v1823_v0  ;;  %s1826_s25 = smov (!%p498_p3), 112   ;;  %vm1115_vm3 = vcmask (!%p498_p3), 261120   ;;  %vm1087_vm4 = vcmask (!%p498_p3), 130048   ;;  %vm1089_vm5 = vcmask (!%p498_p3), 195584   ;;  %vm1200_vm6 = vcmask (!%p498_p3), 257024  }
   0x8   : > { %1672 = vmatprep.subr.bf16.mxu1 (!%p498_p3), %v1823_v0  ;;  %1674 = vmatprep.mubr.msk.bf16.mxu1 (!%p498_p3), %vm1824_vm0, %v1823_v0  ;;  %s1827_s26 = smov (!%p498_p3), 104   ;;  %s1828_s22 = smov (!%p498_p3), 8   ;;  %1202 = vst.msk [vmem:[#allocation4] sm:$0xff] (!%p498_p3), %vm1115_vm3, %v1823_v0 }
   0xe   : > { %s2131_s29 = smov (!%p574_p4, %s1813_s29), 1 }
   0xf   : > { %s1933_s17 = sshll.u32 %s2131_s29, 2 }
  0x10   : > { %s591_s20 = scalar_lea.vmem %s2113_s2, %s1933_s17  ;;  %s587_s23 = scalar_lea.vmem %s2112_s1, %s1933_s17 }
  0x11   : > { %v623_v1 = vld [vmem:[%s591_s20] sm:$0xf]  ;;  %s595_s18 = scalar_lea.vmem %s2114_s3, %s1933_s17 }
  0x12   : > { %v630_v2 = vsel %vm625_vm1, %v623_v1, 0  ;;  %v622_v3 = vld [vmem:[%s587_s23] sm:$0xf]  ;;  %v1586_v10 = vcombine.low %v623_v1, %v623_v1  ;;  %s1829_s23 = smov 16  }
  0x13   : > { %1649 = vmatpush3.bf16.xpose.msra.mxu0 %v630_v2  ;;  %v1585_v11 = vcombine.low %v622_v3, %v622_v3  ;;  %v1959_v17 = vld [vmem:[%s595_s18] sm:$0xf] }
  0x14   : > { %1654 = vmatprep.subr.bf16.mxu0 %v1823_v0  ;;  %740 = vrot.lane.b32.xlu1 %v1586_v10, %s1825_s24  ;;  %v690_v18 = vsel %vm688_vm2, %v1959_v17, 0 }
  0x18   : > { %735 = vrot.lane.b32.xlu1 %v1585_v11, %s1825_s24 }
  0x1a   : > { %1651 = vmatmul.mubr.msk.bf16.vlgmr.msra.gmra.mrb[0].mxu0 %vm625_vm1, %v622_v3 }
  0x1b   : > { %1656 = vmatprep.mubr.msk.bf16.mxu0 %vm1824_vm0, %v1823_v0  ;;  %1655 = vmatpush3.bf16.msra.mxu0 %v690_v18 }
  0x1c   : > { %852 = vrot.lane.b32.xlu1 %v1585_v11, %s1826_s25  ;;  %1660 = vmatprep.subr.bf16.mxu0 %v1823_v0 }
  0x20   : > { %965 = vrot.lane.b32.xlu1 %v1586_v10, %s1827_s26 }
  0x24   : > { %963 = vrot.lane.b32.xlu1 %v1585_v11, %s1827_s26 }
  0x86   : > { %v741_v19 = vpop.permute.xlu1 %740 }
  0x87   : > { %v746_v30 = vsel %vm625_vm1, %v741_v19, 0 }
  0x8a   : > { %v736_v20 = vpop.permute.xlu1 %735 }
  0x8e   : > { %v853_v22 = vpop.permute.xlu1 %852 }
  0x92   : > { %v966_v25 = vpop.permute.xlu1 %965 }
  0x93   : > { %v971_v27 = vsel %vm625_vm1, %v966_v25, 0  ;;  %v1767_v25 = vld [vmem:[%s2115_s4] sm:$0xff]  }
  0x96   : > { %v964_v31 = vpop.permute.xlu1 %963 }
  0xed   : > { %v666_v4 = vpop.f32.mrb[0].mxu0 }
  0xee   : > { %v672_v5 = vmul.f32 0.35355338, %v666_v4  ;;  %v1652_v6 = vpop.f32.mrb[1].mxu0 }
  0xef   : > { %v669_v7 = vpop.f32.mrb[2].mxu0  ;;  %v1588_v6 = vcombine.low %v1959_v17, %v1959_v17 }
  0xf0   : > { %v1653_v8 = vpop.f32.mrb[3].mxu0  ;;  %v673_v9 = vsel %vm625_vm1, %v672_v5, -inf }
  0xf1   : > { %674 = vmax.xlane.f32.xlu0 %v673_v9 }
 0x17e   : > { %v675_v12 = vpop.xlane.xlu0 %674 }
 0x17f   : > { %v676_v13 = vsub.f32 %v672_v5, %v675_v12 }
 0x181   : > { %v677_v14 = vmul.f32 1.442695, %v676_v13 }
 0x183   : > { %1779 = vpow2.f32 %v677_v14 }
 0x18d   : > { %v1780_v15 = vpop.eup %1779 }
 0x18e   : > { %v679_v16 = vsel %vm625_vm1, %v1780_v15, 0.0 }
 0x18f   : > { %680 = vadd.xlane.f32.xlu0 %v679_v16 }
 0x1a5   : > { %854 = vrot.lane.b32.xlu0 %v1586_v10, %s1826_s25 }
 0x21c   : > { %v681_v21 = vpop.xlane.xlu0 %680 }
 0x21d   : > { %1781 = vrcp.f32 %v681_v21 }
 0x220   : > { %v855_v23 = vpop.permute.xlu0 %854 }
 0x221   : > { %v860_v24 = vsel %vm625_vm1, %v855_v23, 0 }
 0x222   : > { %1673 = vmatpush3.bf16.xpose.msra.mxu1 %v860_v24 }
 0x223   : > { %1684 = vmatprep.subr.bf16.mxu1 %v1823_v0 }
 0x227   : > { %v1782_v26 = vpop.eup %1781 }
 0x228   : > { %v683_v28 = vmul.f32 %v1782_v26, %v1780_v15  ;;  %v1768_v26 = vld [vmem:[%s2115_s4 + $0x8] sm:$0xff]  }
 0x229   : > { %1675 = vmatmul.mubr.msk.bf16.vlgmr.msra.gmra.mrb[0].mxu1 %vm625_vm1, %v853_v22 }
 0x22a   : > { %v684_v29 = vpack.c.bf16 %v683_v28, %v683_v28  ;;  %1685 = vmatpush3.bf16.xpose.msra.mxu1 %v971_v27  ;;  %1686 = vmatprep.mubr.msk.bf16.mxu1 %vm1824_vm0, %v1823_v0 }
 0x22b   : > { %1696 = vmatprep.subr.bf16.mxu1 %v1823_v0 }
 0x22c   : > { %1657 = vmatmul.mubr.msk.bf16.vlgmr.msra.gmra.mrb[4].mxu0 %vm625_vm1, %v684_v29 }
 0x22d   : > { %1661 = vmatpush3.bf16.xpose.msra.mxu0 %v746_v30  ;;  %1662 = vmatprep.mubr.msk.bf16.mxu0 %vm1824_vm0, %v1823_v0 }
 0x22e   : > { %1666 = vmatprep.subr.bf16.mxu0 %v1823_v0 }
 0x231   : > { %1687 = vmatmul.mubr.msk.bf16.vlgmr.msra.gmra.mrb[4].mxu1 %vm625_vm1, %v964_v31 }
 0x232   : > { %1700 = vmatprep.mubr.msk.bf16.mxu1 %vm1824_vm0, %v1823_v0  ;;  %1697 = vmatpush3.bf16.msra.mxu1 %v1767_v25 }
 0x233   : > { %1698 = vmatprep.subr.bf16.mxu1 %v1823_v0 }
 0x234   : > { %1663 = vmatmul.mubr.msk.bf16.vlgmr.msra.gmra.mrb[8].mxu0 %vm625_vm1, %v736_v20 }
 0x235   : > { %1668 = vmatprep.mubr.msk.bf16.mxu0 %vm1824_vm0, %v1823_v0 }
 0x236   : > { %1699 = vmatpush3.bf16.msra.mxu1 %v1768_v26 }
 0x237   : > { %1712 = vmatprep.subr.bf16.mxu1 %v1823_v0 }
 0x2fc   : > { %v896_v32 = vpop.f32.mrb[0].mxu1 }
 0x2fd   : > { %v902_v33 = vmul.f32 0.35355338, %v896_v32  ;;  %v1676_v34 = vpop.f32.mrb[1].mxu1 }
 0x2fe   : > { %v899_v35 = vpop.f32.mrb[2].mxu1 }
 0x2ff   : > { %v1983_v36 = vpop.f32.mrb[4].mxu0  ;;  %v1677_v37 = vpop.f32.mrb[3].mxu1  ;;  %v903_v38 = vsel %vm625_vm1, %v902_v33, -inf }
 0x300   : > { %904 = vmax.xlane.f32.xlu0 %v903_v38  ;;  %v1658_v39 = vpop.f32.mrb[5].mxu0 }
 0x301   : > { %v729_v40 = vpop.f32.mrb[6].mxu0 }
 0x302   : > { %v1659_v41 = vpop.f32.mrb[7].mxu0 }
 0x304   : > { %v1007_v42 = vpop.f32.mrb[4].mxu1 }
 0x305   : > { %v1688_v43 = vpop.f32.mrb[5].mxu1  ;;  %v1013_v49 = vmul.f32 0.35355338, %v1007_v42 }
 0x306   : > { %v1010_v44 = vpop.f32.mrb[6].mxu1 }
 0x307   : > { %v782_v45 = vpop.f32.mrb[8].mxu0  ;;  %v1689_v46 = vpop.f32.mrb[7].mxu1  ;;  %v1014_v53 = vsel %vm625_vm1, %v1013_v49, -inf }
 0x308   : > { %v788_v47 = vmul.f32 0.35355338, %v782_v45  ;;  %v1664_v48 = vpop.f32.mrb[9].mxu0 }
 0x309   : > { %v785_v50 = vpop.f32.mrb[10].mxu0  ;;  %v1598_v48 = vld [vmem:[%s2117_s6] ss:$0 sm:$0xff] }
 0x30a   : > { %v1665_v51 = vpop.f32.mrb[11].mxu0  ;;  %v789_v52 = vsel %vm625_vm1, %v788_v47, -inf }
 0x30b   : > { %790 = vmax.xlane.f32.xlu1 %v789_v52 }
 0x30f   : > { %1015 = vmax.xlane.f32.xlu1 %v1014_v53 }
 0x38d   : > { %v905_v54 = vpop.xlane.xlu0 %904 }
 0x38e   : > { %v906_v55 = vsub.f32 %v902_v33, %v905_v54 }
 0x390   : > { %v907_v56 = vmul.f32 1.442695, %v906_v55 }
 0x392   : > { %1783 = vpow2.f32 %v907_v56 }
 0x398   : > { %v791_v57 = vpop.xlane.xlu1 %790 }
 0x399   : > { %v792_v58 = vsub.f32 %v788_v47, %v791_v57  ;;  %v1594_v47 = vld [vmem:[%s2116_s5] ss:$0 sm:$0xff] }
 0x39b   : > { %v793_v63 = vmul.f32 1.442695, %v792_v58 }
 0x39c   : > { %v1784_v59 = vpop.eup %1783  ;;  %v1016_v60 = vpop.xlane.xlu1 %1015 }
 0x39d   : > { %v1017_v61 = vsub.f32 %v1013_v49, %v1016_v60  ;;  %v909_v62 = vsel %vm625_vm1, %v1784_v59, 0.0 }
 0x39e   : > { %910 = vadd.xlane.f32.xlu0 %v909_v62  ;;  %v1769_v62 = vld [vmem:[%s2120_s9] sm:$0xff]  }
 0x39f   : > { %v1018_v1 = vmul.f32 1.442695, %v1017_v61 }
 0x3a1   : > { %1785 = vpow2.f32 %v1018_v1 }
 0x3a2   : > { %1787 = vpow2.f32 %v793_v63  ;;  %v1770_v63 = vld [vmem:[%s2120_s9 + $0x8] sm:$0xff]  }
 0x3ab   : > { %v1786_v2 = vpop.eup %1785 }
 0x3ac   : > { %v1020_v3 = vsel %vm625_vm1, %v1786_v2, 0.0  ;;  %v1788_v4 = vpop.eup %1787 }
 0x3ad   : > { %1021 = vadd.xlane.f32.xlu1 %v1020_v3  ;;  %v795_v5 = vsel %vm625_vm1, %v1788_v4, 0.0 }
 0x3b1   : > { %796 = vadd.xlane.f32.xlu1 %v795_v5  ;;  %v1599_v5 = vld [vmem:[%s2118_s7] ss:$0 sm:$0xff] }
 0x3b4   : > { %804 = vrot.lane.b32.xlu0 %v1588_v6, %s1825_s24  ;;  %s1830_s24 = smov 24  }
 0x3c2   : > { %915 = vrot.lane.b32.xlu1 %v1588_v6, %s1826_s25  ;;  %s1578_s25 = sshll.u32 %s2131_s29, 3 }
 0x3c3   : > { %s580_s17 = scalar_lea.vmem %s2111_s0, %s1578_s25  ;;  %s615_s20 = scalar_lea.vmem %s2125_s14, %s1578_s25 }
 0x3c4   : > { %v621_v51 = vld [vmem:[%s580_s17] sm:$0xff] }
 0x3c6   : > { %1026 = vrot.lane.b32.xlu1 %v1588_v6, %s1827_s26 }
 0x42b   : > { %v911_v7 = vpop.xlane.xlu0 %910 }
 0x42f   : > { %v805_v8 = vpop.permute.xlu0 %804 }
 0x430   : > { %v810_v9 = vsel %vm688_vm2, %v805_v8, 0 }
 0x431   : > { %1667 = vmatpush3.bf16.msra.mxu0 %v810_v9 }
 0x432   : > { %1678 = vmatprep.subr.bf16.mxu0 %v1823_v0 }
 0x43a   : > { %v1022_v10 = vpop.xlane.xlu1 %1021 }
 0x43e   : > { %v797_v11 = vpop.xlane.xlu1 %796 }
 0x43f   : > { %1789 = vrcp.f32 %v797_v11 }
 0x440   : > { %1791 = vrcp.f32 %v911_v7  ;;  %v1600_v7 = vld [vmem:[%s2119_s8] ss:$0 sm:$0xff] }
 0x441   : > { %1793 = vrcp.f32 %v1022_v10 }
 0x442   : > { %v916_v13 = vpop.permute.xlu1 %915 }
 0x443   : > { %v921_v15 = vsel %vm688_vm2, %v916_v13, 0  ;;  %v1772_v13 = vld [vmem:[%s2122_s11 + $0x8] sm:$0xff]  }
 0x446   : > { %v1027_v19 = vpop.permute.xlu1 %1026 }
 0x447   : > { %v1032_v20 = vsel %vm688_vm2, %v1027_v19, 0  ;;  %v1778_v19 = vld [vmem:[%s2122_s11 + $0x38] sm:$0xff]  }
 0x449   : > { %v1790_v12 = vpop.eup %1789 }
 0x44a   : > { %v799_v14 = vmul.f32 %v1790_v12, %v1788_v4  ;;  %v1792_v17 = vpop.eup %1791  ;;  %v1771_v12 = vld [vmem:[%s2122_s11] sm:$0xff]  }
 0x44b   : > { %v913_v18 = vmul.f32 %v1792_v17, %v1784_v59  ;;  %v1794_v22 = vpop.eup %1793  ;;  %v1776_v17 = vld [vmem:[%s2122_s11 + $0x28] sm:$0xff]  }
 0x44c   : > { %v800_v16 = vpack.c.bf16 %v799_v14, %v799_v14  ;;  %v1024_v23 = vmul.f32 %v1794_v22, %v1786_v2  ;;  %v1773_v14 = vld [vmem:[%s2122_s11 + $0x10] sm:$0xff]  }
 0x44d   : > { %v914_v21 = vpack.c.bf16 %v913_v18, %v913_v18  ;;  %v1777_v18 = vld [vmem:[%s2122_s11 + $0x30] sm:$0xff]  }
 0x44e   : > { %1669 = vmatmul.mubr.msk.bf16.vlgmr.msra.gmra.mrb[12].mxu0 %vm625_vm1, %v800_v16  ;;  %v1025_v24 = vpack.c.bf16 %v1024_v23, %v1024_v23  ;;  %v1775_v16 = vld [vmem:[%s2122_s11 + $0x20] sm:$0xff]  }
 0x44f   : > { %1679 = vmatpush3.bf16.msra.mxu0 %v921_v15  ;;  %1680 = vmatprep.mubr.msk.bf16.mxu0 %vm1824_vm0, %v1823_v0  ;;  %v1774_v15 = vld [vmem:[%s2122_s11 + $0x18] sm:$0xff]  }
 0x450   : > { %1690 = vmatprep.subr.bf16.mxu0 %v1823_v0 }
 0x456   : > { %1681 = vmatmul.mubr.msk.bf16.vlgmr.msra.gmra.mrb[16].mxu0 %vm625_vm1, %v914_v21 }
 0x457   : > { %1691 = vmatpush3.bf16.msra.mxu0 %v1032_v20  ;;  %1692 = vmatprep.mubr.msk.bf16.mxu0 %vm1824_vm0, %v1823_v0  ;;  %v1601_v20 = vld [vmem:[%s2121_s10] ss:$0 sm:$0xff] }
 0x458   : > { %1704 = vmatprep.subr.bf16.mxu0 %v1823_v0 }
 0x45e   : > { %1693 = vmatmul.mubr.msk.bf16.vlgmr.msra.gmra.mrb[20].mxu0 %vm625_vm1, %v1025_v24 }
 0x45f   : > { %1708 = vmatprep.mubr.msk.bf16.mxu0 %vm1824_vm0, %v1823_v0  ;;  %1705 = vmatpush3.bf16.msra.mxu0 %v1769_v62 }
 0x460   : > { %1706 = vmatprep.subr.bf16.mxu0 %v1823_v0 }
 0x463   : > { %1707 = vmatpush3.bf16.msra.mxu0 %v1770_v63 }
 0x521   : > { %v846_v27 = vpop.f32.mrb[12].mxu0 }
 0x522   : > { %1075 = vrot.lane.b32.xlu0 %v846_v27, %s1828_s22  ;;  %v1670_v28 = vpop.f32.mrb[13].mxu0 }
 0x523   : > { %v849_v29 = vpop.f32.mrb[14].mxu0 }
 0x524   : > { %v1671_v30 = vpop.f32.mrb[15].mxu0 }
 0x529   : > { %v957_v31 = vpop.f32.mrb[16].mxu0 }
 0x52a   : > { %1079 = vrot.lane.b32.xlu1 %v957_v31, %s1829_s23  ;;  %v1682_v32 = vpop.f32.mrb[17].mxu0 }
 0x52b   : > { %v960_v33 = vpop.f32.mrb[18].mxu0 }
 0x52c   : > { %v1683_v34 = vpop.f32.mrb[19].mxu0 }
 0x531   : > { %v1068_v35 = vpop.f32.mrb[20].mxu0 }
 0x532   : > { %1083 = vrot.lane.b32.xlu0 %v1068_v35, %s1830_s24  ;;  %v1694_v37 = vpop.f32.mrb[21].mxu0  ;;  %v1280_v35 = vld [vmem:[#allocation4] sm:$0xff] }
 0x533   : > { %v1071_v38 = vpop.f32.mrb[22].mxu0 }
 0x534   : > { %v1695_v39 = vpop.f32.mrb[23].mxu0 }
 0x594   : > { %v1076_v40 = vpop.permute.xlu0 %1075 }
 0x595   : > { %v1086_v42 = vsel %vm625_vm1, %v1983_v36, %v1076_v40 }
 0x59c   : > { %v1080_v41 = vpop.permute.xlu1 %1079 }
 0x59d   : > { %v1088_v43 = vsel %vm1087_vm4, %v1086_v42, %v1080_v41  ;;  %v1613_v42 = vld [vmem:[%s2123_s12] ss:$0 sm:$0xff] }
 0x5a4   : > { %v1084_v44 = vpop.permute.xlu0 %1083 }
 0x5a5   : > { %v1090_v45 = vsel %vm1089_vm5, %v1088_v43, %v1084_v44  ;;  %v1614_v44 = vld [vmem:[%s2124_s13] ss:$0 sm:$0xff] }
 0x5a6   : > { %v1091_v46 = vpack.c.bf16 %v1090_v45, %v1090_v45 }
 0x5a8   : > { %1701 = vmatmul.mubr.msk.bf16.vlgmr.msra.gmra.mrb[8].mxu1 %vm1115_vm3, %v1091_v46 }
 0x5a9   : > { %1728 = vmatprep.mubr.msk.bf16.mxu1 %vm1824_vm0, %v1823_v0  ;;  %1713 = vmatpush3.bf16.msra.mxu1 %v1771_v12 }
 0x5aa   : > { %1714 = vmatprep.subr.bf16.mxu1 %v1823_v0 }
 0x5ad   : > { %1715 = vmatpush3.bf16.msra.mxu1 %v1772_v13 }
 0x5ae   : > { %1716 = vmatprep.subr.bf16.mxu1 %v1823_v0 }
 0x5b1   : > { %1717 = vmatpush3.bf16.msra.mxu1 %v1773_v14 }
 0x5b2   : > { %1718 = vmatprep.subr.bf16.mxu1 %v1823_v0 }
 0x5b5   : > { %1719 = vmatpush3.bf16.msra.mxu1 %v1774_v15 }
 0x5b6   : > { %1720 = vmatprep.subr.bf16.mxu1 %v1823_v0 }
 0x5b9   : > { %1721 = vmatpush3.bf16.msra.mxu1 %v1775_v16 }
 0x5ba   : > { %1722 = vmatprep.subr.bf16.mxu1 %v1823_v0 }
 0x5bd   : > { %1723 = vmatpush3.bf16.msra.mxu1 %v1776_v17 }
 0x5be   : > { %1724 = vmatprep.subr.bf16.mxu1 %v1823_v0 }
 0x5c1   : > { %1725 = vmatpush3.bf16.msra.mxu1 %v1777_v18 }
 0x5c2   : > { %1726 = vmatprep.subr.bf16.mxu1 %v1823_v0 }
 0x5c5   : > { %1727 = vmatpush3.bf16.msra.mxu1 %v1778_v19 }
 0x67b   : > { %v1153_v36 = vpop.f32.mrb[8].mxu1 }
 0x67c   : > { %v1154_v49 = vadd.f32 %v1594_v47, %v1153_v36  ;;  %v1702_v50 = vpop.f32.mrb[9].mxu1 }
 0x67d   : > { %v1156_v52 = vpop.f32.mrb[10].mxu1 }
 0x67e   : > { %v1166_v53 = vmul.f32 %v1598_v48, %v1154_v49  ;;  %v1703_v54 = vpop.f32.mrb[11].mxu1 }
 0x680   : > { %v1167_v55 = vadd.f32 %v1166_v53, %v621_v51 }
 0x682   : > { %1168 = vst.msk [vmem:[#allocation2] sm:$0xff] %vm1115_vm3, %v1167_v55  ;;  %v1169_v56 = vsel %vm1115_vm3, %v1167_v55, 0.0 }
 0x683   : > { %1170 = vadd.xlane.f32.xlu1 %v1169_v56 }
 0x689   : > { %v1391_v47 = vld [vmem:[#allocation2] sm:$0xff] }
 0x710   : > { %v1171_v57 = vpop.xlane.xlu1 %1170 }
 0x711   : > { %v1173_v58 = vmul.f32 0.03125, %v1171_v57 }
 0x713   : > { %v1174_v59 = vsub.f32 %v1167_v55, %v1173_v58 }
 0x715   : > { %v1175_v60 = vmul.f32 %v1174_v59, %v1174_v59 }
 0x717   : > { %v1176_v61 = vsel %vm1115_vm3, %v1175_v60, 0.0 }
 0x718   : > { %1177 = vadd.xlane.f32.xlu0 %v1176_v61 }
 0x7a5   : > { %v1178_v1 = vpop.xlane.xlu0 %1177 }
 0x7a6   : > { %v1179_v2 = vmul.f32 0.03125, %v1178_v1 }
 0x7a8   : > { %v1180_v3 = vadd.f32 1e-06, %v1179_v2 }
 0x7aa   : > { %1795 = vrsqrt.f32 %v1180_v3 }
 0x7b4   : > { %v1796_v4 = vpop.eup %1795 }
 0x7b5   : > { %v1182_v6 = vmul.f32 %v1796_v4, %v1174_v59 }
 0x7b7   : > { %v1190_v8 = vmul.f32 %v1599_v5, %v1182_v6 }
 0x7b9   : > { %v1198_v9 = vadd.f32 %v1600_v7, %v1190_v8 }
 0x7bb   : > { %v1199_v10 = vpack.c.bf16 %v1198_v9, %v1198_v9 }
 0x7bd   : > { %1201 = vst.msk [vmem:[#allocation3] sm:$0xf] %vm1200_vm6, %v1199_v10 }
 0x7c4   : > { %v1203_v11 = vld [vmem:[#allocation3] sm:$0xf] }
 0x7c5   : > { %1709 = vmatmul.mubr.msk.bf16.vlgmr.msra.gmra.mrb[24].mxu0 %vm1115_vm3, %v1203_v11 }
 0x898   : > { %v1265_v21 = vpop.f32.mrb[24].mxu0 }
 0x899   : > { %v1266_v22 = vadd.f32 %v1601_v20, %v1265_v21  ;;  %v1710_v23 = vpop.f32.mrb[25].mxu0 }
 0x89a   : > { %v1268_v24 = vpop.f32.mrb[26].mxu0 }
 0x89b   : > { %v1271_v25 = vmul.f32 %v1266_v22, %v1266_v22  ;;  %v1711_v26 = vpop.f32.mrb[27].mxu0 }
 0x89d   : > { %v1272_v27 = vmul.f32 %v1271_v25, %v1266_v22 }
 0x89f   : > { %v1273_v28 = vmul.f32 0.044715, %v1272_v27 }
 0x8a1   : > { %v1274_v29 = vadd.f32 %v1273_v28, %v1266_v22 }
 0x8a3   : > { %v1275_v30 = vmul.f32 0.7978846, %v1274_v29 }
 0x8a5   : > { %1797 = vtanh.f32 %v1275_v30 }
 0x8af   : > { %v1798_v31 = vpop.eup %1797 }
 0x8b0   : > { %v1277_v32 = vadd.f32 1.0, %v1798_v31 }
 0x8b2   : > { %v1278_v33 = vmul.f32 0.5, %v1277_v32 }
 0x8b4   : > { %v1279_v0 = vmul.f32 %v1278_v33, %v1266_v22 }
 0x8b6   : > { %v1281_v34 = vpack.c.bf16 %v1279_v0, %v1279_v0 }
 0x8b8   : > { %1729 = vmatmul.mubr.bf16.vlgmr.msra.gmra.mrb[12].mxu1 %v1281_v34 }
 0x98b   : > { %v1380_v37 = vpop.f32.mrb[12].mxu1 }
 0x98c   : > { %v1386_v38 = vadd.f32 %v1380_v37, %v1280_v35  ;;  %v1730_v39 = vpop.f32.mrb[13].mxu1 }
 0x98d   : > { %v1383_v40 = vpop.f32.mrb[14].mxu1 }
 0x98e   : > { %1387 = vst.msk [vmem:[#allocation4] sm:$0xff] %vm1115_vm3, %v1386_v38  ;;  %v1731_v41 = vpop.f32.mrb[15].mxu1 }
 0x995   : > { %v1392_v43 = vld [vmem:[#allocation4] sm:$0xff] }
 0x996   : > { %v1400_v45 = vadd.f32 %v1613_v42, %v1392_v43 }
 0x998   : > { %v1408_v46 = vmul.f32 %v1614_v44, %v1400_v45 }
 0x99a   : > { %v1409_v36 = vadd.f32 %v1408_v46, %v1391_v47 }
 0x99c   : > { %1410 = vst.msk [vmem:[%s615_s20] sm:$0xff] %vm1115_vm3, %v1409_v36 }
 0x99d PF: > { %s24_s15 = sadd.s32 1, %s1821_s15   ;;  %s2126_s29 = smov %s1817_s30 }
 0x99e   : > { %p21_p5 = scmp.ge.s32.totalorder %s24_s15, 4   ;;  %s2127_s30 = smov %s2129_s16 }
 0x9a0   :  { %23 = sbr.rel (!%p21_p5) target bundleno = 2 (0x2), region = 132 }

// kernel: transformer_stage.11
= control target key start
LH: loop header
LB: loop body
LE: loop exit
PB: predicated region body
PF: predicated region fallthrough
CT: control target
= control target key end

     0   :  { %s2281_s0 = inlined_call_operand.vmem [shape: f32[2,8,32], index: 0, kind: input, shape index: {}]   ;;  %s2282_s1 = inlined_call_operand.vmem [shape: bf16[2,8,32], index: 1, kind: input, shape index: {}]   ;;  %s2283_s2 = inlined_call_operand.vmem [shape: bf16[2,8,32], index: 2, kind: input, shape index: {}]   ;;  %s2284_s3 = inlined_call_operand.vmem [shape: bf16[2,8,32], index: 3, kind: input, shape index: {}]   ;;  %s2285_s4 = inlined_call_operand.vmem [shape: bf16[32,32], index: 4, kind: input, shape index: {}]   ;;  %s2286_s5 = inlined_call_operand.vmem [shape: f32[1,32], index: 5, kind: input, shape index: {}]   ;;  %s2287_s6 = inlined_call_operand.vmem [shape: f32[1,32], index: 6, kind: input, shape index: {}]   ;;  %s2288_s7 = inlined_call_operand.vmem [shape: f32[1,32], index: 7, kind: input, shape index: {}]   ;;  %s2289_s8 = inlined_call_operand.vmem [shape: f32[1,32], index: 8, kind: input, shape index: {}]   ;;  %s2290_s9 = inlined_call_operand.vmem [shape: bf16[32,128], index: 9, kind: input, shape index: {}]   ;;  %s2291_s10 = inlined_call_operand.vmem [shape: f32[1,128], index: 10, kind: input, shape index: {}]   ;;  %s2292_s11 = inlined_call_operand.vmem [shape: bf16[128,32], index: 11, kind: input, shape index: {}]   ;;  %s2293_s12 = inlined_call_operand.vmem [shape: f32[1,32], index: 12, kind: input, shape index: {}]   ;;  %s2294_s13 = inlined_call_operand.vmem [shape: f32[1,32], index: 13, kind: input, shape index: {}]   ;;  %s2295_s14 = inlined_call_operand.hbm [shape: f32[2,8,32], index: 14, kind: output, shape index: {}]  }
   0x1   :  { %2298 = sst [smem:[#allocation10_spill]] %s2281_s0 }
   0x2   :  { %2299 = sst [smem:[#allocation11_spill]] %s2282_s1 }
   0x3   :  { %2300 = sst [smem:[#allocation12_spill]] %s2283_s2 }
   0x4   :  { %2301 = sst [smem:[#allocation13_spill]] %s2284_s3 }
   0x5   :  { %19 = vsyncpa [#allocation6], 0 }
   0x6   :  { %21 = vsyncpa [#allocation6 + $0x1], 0  ;;  %s2001_s29 = smov 0   ;;  %s2003_s30 = smov 0  }
   0x7   :  { %s2005_s15 = smov 0   ;;  %s2007_s16 = smov 0  }
   0x8   :  { %s2009_s17 = smov 0   ;;  %s2011_s18 = smov 0  }
   0x9 LB: > { %2302 = sst [smem:[#allocation8_spill]] %s1911_s17  ;;  %s1575_s19 = sadd.s32 4294967295, %s1915_s18   ;;  %s1915_s18 = sphi %s2011_s18, %s27_s18   ;;  %s1911_s17 = sphi %s2009_s17, %s2311_s17   ;;  %s1907_s16 = sphi %s2007_s16, %s2310_s16   ;;  %s1903_s15 = sphi %s2005_s15, %s2314_s15   ;;  %s1899_s30 = sphi %s2003_s30, %s2313_s30   ;;  %s1895_s29 = sphi %s2001_s29, %s2312_s29  }
   0xa   : > { %s1576_s20 = sadd.s32 4294967294, %s1915_s18   ;;  %s46_s21 = sadd.s32 1, %s1911_s17 }
   0xb   : > { %s388_s22 = sadd.s32 1, %s1903_s15  ;;  %p48_p0 = scmp.ge.s32.totalorder %s46_s21, 2 }
   0xc   : > { %p398_p1 = scmp.ne.s32.totalorder %s1903_s15, %s1899_s30  ;;  %p399_p2 = scmp.eq.s32.totalorder %s1575_s19, 1 }
   0xd   : > { %p404_p3 = scmp.ne.s32.totalorder %s1899_s30, %s1895_s29  ;;  %s2316_s21 = smov (%p48_p0, %s46_s21), 0 }
   0xe   : > { %2303 = sst [smem:[#allocation9_spill]] %s2316_s21  ;;  %p2041_p4 = por %p399_p2, %p398_p1 }
   0xf   : > { %p405_p5 = scmp.eq.s32.totalorder %s1576_s20, 1  ;;  %s383_s24 = ssub.s32 %s1911_s17, %s2316_s21 }
  0x10   : > { %p1582_p6 = scmp.ge.s32.totalorder %s1915_s18, 1  ;;  %p386_p7 = scmp.eq.s32.totalorder %s383_s24, 0 }
  0x11   : > { %p2048_p8 = por %p405_p5, %p404_p3  ;;  %p500_p9 = scmp.lt.s32.totalorder %s1915_s18, 3 }
  0x12   : > { %s2054_s26 = scalar_select %p386_p7, %s1903_s15, %s388_s22  }
  0x13   : > { %p501_p10 = pnand %p1582_p6, %p500_p9 }
  0x14   : > { %p575_p11 = scmp.lt.s32.totalorder (!%p501_p10), %s1907_s16, 1  ;;  %v1917_v0 = vmov (!%p501_p10), 0.0   ;;  %vm1918_vm0 = vmmov (!%p501_p10), 0   ;;  %vm619_vm1 = vcmask (!%p501_p10), 64512   ;;  %s2306_s2 = sld [smem:[#allocation12_spill]] (!%p501_p10)  ;;  %vm682_vm2 = vcmask (!%p501_p10), 1043456  }
  0x15   : > { %504 = sbr.rel (%p501_p10) target bundleno = 2489 (0x9b9), region = 76  ;;  %1655 = vmatprep.subr.bf16.mxu0 (!%p501_p10), %v1917_v0  ;;  %1657 = vmatprep.mubr.msk.bf16.mxu0 (!%p501_p10), %vm1918_vm0, %v1917_v0  ;;  %s2307_s1 = sld [smem:[#allocation11_spill]] (!%p501_p10)  ;;  %vm1109_vm3 = vcmask (!%p501_p10), 261120   ;;  %vm1081_vm4 = vcmask (!%p501_p10), 130048   ;;  %vm1083_vm5 = vcmask (!%p501_p10), 195584   ;;  %vm1194_vm6 = vcmask (!%p501_p10), 257024  }
  0x16   : > { %1679 = vmatprep.subr.bf16.mxu1 (!%p501_p10), %v1917_v0  ;;  %1681 = vmatprep.mubr.msk.bf16.mxu1 (!%p501_p10), %vm1918_vm0, %v1917_v0  ;;  %s1919_s19 = smov (!%p501_p10), 120   ;;  %s1921_s21 = smov (!%p501_p10), 104   ;;  %1196 = vst.msk [vmem:[#allocation4] sm:$0xff] (!%p501_p10), %vm1109_vm3, %v1917_v0 }
  0x17   : > { %s2308_s3 = sld [smem:[#allocation13_spill]] (!%p501_p10)  ;;  %s1922_s20 = smov (!%p501_p10), 8  }
  0x18   : > { %s2309_s0 = sld [smem:[#allocation10_spill]] (!%p501_p10) }
  0x1c   : > { %s2061_s27 = scalar_select %p575_p11, %s1907_s16, 1 }
  0x1e   : > { %s2067_s28 = sshll.u32 %s2061_s27, 2 }
  0x1f   : > { %s592_s22 = scalar_lea.vmem %s2306_s2, %s2067_s28  ;;  %s588_s17 = scalar_lea.vmem %s2307_s1, %s2067_s28 }
  0x20   : > { %v617_v1 = vld [vmem:[%s592_s22] sm:$0xf]  ;;  %s596_s24 = scalar_lea.vmem %s2308_s3, %s2067_s28  ;;  %s1923_s22 = smov 16  }
  0x21   : > { %v624_v2 = vsel %vm619_vm1, %v617_v1, 0  ;;  %v616_v3 = vld [vmem:[%s588_s17] sm:$0xf]  ;;  %v1591_v10 = vcombine.low %v617_v1, %v617_v1  ;;  %s1920_s17 = smov 112   ;;  %s1584_s28 = sshll.u32 %s2061_s27, 3 }
  0x22   : > { %1656 = vmatpush3.bf16.xpose.msra.mxu0 %v624_v2  ;;  %v1590_v11 = vcombine.low %v616_v3, %v616_v3  ;;  %v2093_v17 = vld [vmem:[%s596_s24] sm:$0xf]  ;;  %s1924_s24 = smov 24  }
  0x23   : > { %1661 = vmatprep.subr.bf16.mxu0 %v1917_v0  ;;  %734 = vrot.lane.b32.xlu1 %v1591_v10, %s1919_s19  ;;  %v684_v18 = vsel %vm682_vm2, %v2093_v17, 0 }
  0x27   : > { %729 = vrot.lane.b32.xlu1 %v1590_v11, %s1919_s19 }
  0x29   : > { %1658 = vmatmul.mubr.msk.bf16.vlgmr.msra.gmra.mrb[0].mxu0 %vm619_vm1, %v616_v3 }
  0x2a   : > { %1663 = vmatprep.mubr.msk.bf16.mxu0 %vm1918_vm0, %v1917_v0  ;;  %1662 = vmatpush3.bf16.msra.mxu0 %v684_v18 }
  0x2b   : > { %846 = vrot.lane.b32.xlu1 %v1590_v11, %s1920_s17  ;;  %1667 = vmatprep.subr.bf16.mxu0 %v1917_v0 }
  0x2f   : > { %959 = vrot.lane.b32.xlu1 %v1591_v10, %s1921_s21 }
  0x33   : > { %957 = vrot.lane.b32.xlu1 %v1590_v11, %s1921_s21 }
  0x95   : > { %v735_v19 = vpop.permute.xlu1 %734 }
  0x96   : > { %v740_v30 = vsel %vm619_vm1, %v735_v19, 0 }
  0x99   : > { %v730_v20 = vpop.permute.xlu1 %729 }
  0x9d   : > { %v847_v22 = vpop.permute.xlu1 %846 }
  0xa1   : > { %v960_v25 = vpop.permute.xlu1 %959 }
  0xa2   : > { %v965_v27 = vsel %vm619_vm1, %v960_v25, 0  ;;  %v1805_v25 = vld [vmem:[%s2285_s4] sm:$0xff]  }
  0xa5   : > { %v958_v31 = vpop.permute.xlu1 %957 }
  0xfc   : > { %v660_v4 = vpop.f32.mrb[0].mxu0 }
  0xfd   : > { %v666_v5 = vmul.f32 0.35355338, %v660_v4  ;;  %v1659_v6 = vpop.f32.mrb[1].mxu0 }
  0xfe   : > { %v663_v7 = vpop.f32.mrb[2].mxu0  ;;  %v1593_v6 = vcombine.low %v2093_v17, %v2093_v17 }
  0xff   : > { %v1660_v8 = vpop.f32.mrb[3].mxu0  ;;  %v667_v9 = vsel %vm619_vm1, %v666_v5, -inf }
 0x100   : > { %668 = vmax.xlane.f32.xlu0 %v667_v9 }
 0x18d   : > { %v669_v12 = vpop.xlane.xlu0 %668 }
 0x18e   : > { %v670_v13 = vsub.f32 %v666_v5, %v669_v12 }
 0x190   : > { %v671_v14 = vmul.f32 1.442695, %v670_v13 }
 0x192   : > { %1817 = vpow2.f32 %v671_v14 }
 0x19c   : > { %v1818_v15 = vpop.eup %1817 }
 0x19d   : > { %v673_v16 = vsel %vm619_vm1, %v1818_v15, 0.0 }
 0x19e   : > { %674 = vadd.xlane.f32.xlu0 %v673_v16 }
 0x1b4   : > { %848 = vrot.lane.b32.xlu0 %v1591_v10, %s1920_s17 }
 0x22b   : > { %v675_v21 = vpop.xlane.xlu0 %674 }
 0x22c   : > { %1819 = vrcp.f32 %v675_v21 }
 0x22f   : > { %v849_v23 = vpop.permute.xlu0 %848 }
 0x230   : > { %v854_v24 = vsel %vm619_vm1, %v849_v23, 0 }
 0x231   : > { %1680 = vmatpush3.bf16.xpose.msra.mxu1 %v854_v24 }
 0x232   : > { %1691 = vmatprep.subr.bf16.mxu1 %v1917_v0 }
 0x236   : > { %v1820_v26 = vpop.eup %1819 }
 0x237   : > { %v677_v28 = vmul.f32 %v1820_v26, %v1818_v15  ;;  %v1806_v26 = vld [vmem:[%s2285_s4 + $0x8] sm:$0xff]  }
 0x238   : > { %1682 = vmatmul.mubr.msk.bf16.vlgmr.msra.gmra.mrb[0].mxu1 %vm619_vm1, %v847_v22 }
 0x239   : > { %v678_v29 = vpack.c.bf16 %v677_v28, %v677_v28  ;;  %1692 = vmatpush3.bf16.xpose.msra.mxu1 %v965_v27  ;;  %1693 = vmatprep.mubr.msk.bf16.mxu1 %vm1918_vm0, %v1917_v0 }
 0x23a   : > { %1703 = vmatprep.subr.bf16.mxu1 %v1917_v0 }
 0x23b   : > { %1664 = vmatmul.mubr.msk.bf16.vlgmr.msra.gmra.mrb[4].mxu0 %vm619_vm1, %v678_v29 }
 0x23c   : > { %1668 = vmatpush3.bf16.xpose.msra.mxu0 %v740_v30  ;;  %1669 = vmatprep.mubr.msk.bf16.mxu0 %vm1918_vm0, %v1917_v0 }
 0x23d   : > { %1673 = vmatprep.subr.bf16.mxu0 %v1917_v0 }
 0x240   : > { %1694 = vmatmul.mubr.msk.bf16.vlgmr.msra.gmra.mrb[4].mxu1 %vm619_vm1, %v958_v31 }
 0x241   : > { %1707 = vmatprep.mubr.msk.bf16.mxu1 %vm1918_vm0, %v1917_v0  ;;  %1704 = vmatpush3.bf16.msra.mxu1 %v1805_v25 }
 0x242   : > { %1705 = vmatprep.subr.bf16.mxu1 %v1917_v0 }
 0x243   : > { %1670 = vmatmul.mubr.msk.bf16.vlgmr.msra.gmra.mrb[8].mxu0 %vm619_vm1, %v730_v20 }
 0x244   : > { %1675 = vmatprep.mubr.msk.bf16.mxu0 %vm1918_vm0, %v1917_v0 }
 0x245   : > { %1706 = vmatpush3.bf16.msra.mxu1 %v1806_v26 }
 0x246   : > { %1719 = vmatprep.subr.bf16.mxu1 %v1917_v0 }
 0x30b   : > { %v890_v32 = vpop.f32.mrb[0].mxu1 }
 0x30c   : > { %v896_v33 = vmul.f32 0.35355338, %v890_v32  ;;  %v1683_v34 = vpop.f32.mrb[1].mxu1 }
 0x30d   : > { %v893_v35 = vpop.f32.mrb[2].mxu1 }
 0x30e   : > { %v2117_v36 = vpop.f32.mrb[4].mxu0  ;;  %v1684_v37 = vpop.f32.mrb[3].mxu1  ;;  %v897_v38 = vsel %vm619_vm1, %v896_v33, -inf }
 0x30f   : > { %898 = vmax.xlane.f32.xlu0 %v897_v38  ;;  %v1665_v39 = vpop.f32.mrb[5].mxu0 }
 0x310   : > { %v723_v40 = vpop.f32.mrb[6].mxu0 }
 0x311   : > { %v1666_v41 = vpop.f32.mrb[7].mxu0 }
 0x313   : > { %v1001_v42 = vpop.f32.mrb[4].mxu1 }
 0x314   : > { %v1695_v43 = vpop.f32.mrb[5].mxu1  ;;  %v1007_v49 = vmul.f32 0.35355338, %v1001_v42 }
 0x315   : > { %v1004_v44 = vpop.f32.mrb[6].mxu1 }
 0x316   : > { %v776_v45 = vpop.f32.mrb[8].mxu0  ;;  %v1696_v46 = vpop.f32.mrb[7].mxu1  ;;  %v1008_v53 = vsel %vm619_vm1, %v1007_v49, -inf }
 0x317   : > { %v782_v47 = vmul.f32 0.35355338, %v776_v45  ;;  %v1671_v48 = vpop.f32.mrb[9].mxu0 }
 0x318   : > { %v779_v50 = vpop.f32.mrb[10].mxu0 }
 0x319   : > { %v1672_v51 = vpop.f32.mrb[11].mxu0  ;;  %v783_v52 = vsel %vm619_vm1, %v782_v47, -inf }
 0x31a   : > { %784 = vmax.xlane.f32.xlu1 %v783_v52 }
 0x31e   : > { %1009 = vmax.xlane.f32.xlu1 %v1008_v53 }
 0x39c   : > { %v899_v54 = vpop.xlane.xlu0 %898 }
 0x39d   : > { %v900_v55 = vsub.f32 %v896_v33, %v899_v54 }
 0x39f   : > { %v901_v56 = vmul.f32 1.442695, %v900_v55 }
 0x3a1   : > { %1821 = vpow2.f32 %v901_v56 }
 0x3a7   : > { %v785_v57 = vpop.xlane.xlu1 %784 }
 0x3a8   : > { %v786_v58 = vsub.f32 %v782_v47, %v785_v57  ;;  %v1599_v47 = vld [vmem:[%s2286_s5] ss:$0 sm:$0xff] }
 0x3aa   : > { %v787_v63 = vmul.f32 1.442695, %v786_v58 }
 0x3ab   : > { %v1822_v59 = vpop.eup %1821  ;;  %v1010_v60 = vpop.xlane.xlu1 %1009 }
 0x3ac   : > { %v1011_v61 = vsub.f32 %v1007_v49, %v1010_v60  ;;  %v903_v62 = vsel %vm619_vm1, %v1822_v59, 0.0 }
 0x3ad   : > { %904 = vadd.xlane.f32.xlu0 %v903_v62  ;;  %v1807_v62 = vld [vmem:[%s2290_s9] sm:$0xff]  }
 0x3ae   : > { %v1012_v1 = vmul.f32 1.442695, %v1011_v61 }
 0x3b0   : > { %1823 = vpow2.f32 %v1012_v1 }
 0x3b1   : > { %1825 = vpow2.f32 %v787_v63  ;;  %v1808_v63 = vld [vmem:[%s2290_s9 + $0x8] sm:$0xff]  }
 0x3ba   : > { %v1824_v2 = vpop.eup %1823 }
 0x3bb   : > { %v1014_v3 = vsel %vm619_vm1, %v1824_v2, 0.0  ;;  %v1826_v4 = vpop.eup %1825 }
 0x3bc   : > { %1015 = vadd.xlane.f32.xlu1 %v1014_v3  ;;  %v789_v5 = vsel %vm619_vm1, %v1826_v4, 0.0 }
 0x3c0   : > { %790 = vadd.xlane.f32.xlu1 %v789_v5  ;;  %v1604_v5 = vld [vmem:[%s2288_s7] ss:$0 sm:$0xff] }
 0x3c3   : > { %798 = vrot.lane.b32.xlu0 %v1593_v6, %s1919_s19 }
 0x3d1   : > { %909 = vrot.lane.b32.xlu1 %v1593_v6, %s1920_s17 }
 0x3d5   : > { %1020 = vrot.lane.b32.xlu1 %v1593_v6, %s1921_s21  ;;  %s1621_s21 = sshll.u32 %s1907_s16, 7  ;;  %s1925_s16 = smov [#allocation5]  }
 0x3d6   : > { %s2233_s3 = scalar_lea.hbm %s2295_s14, %s1621_s21 }
 0x43a   : > { %v905_v7 = vpop.xlane.xlu0 %904 }
 0x43e   : > { %v799_v8 = vpop.permute.xlu0 %798 }
 0x43f   : > { %v804_v9 = vsel %vm682_vm2, %v799_v8, 0 }
 0x440   : > { %1674 = vmatpush3.bf16.msra.mxu0 %v804_v9 }
 0x441   : > { %1685 = vmatprep.subr.bf16.mxu0 %v1917_v0 }
 0x449   : > { %v1016_v10 = vpop.xlane.xlu1 %1015 }
 0x44d   : > { %v791_v11 = vpop.xlane.xlu1 %790 }
 0x44e   : > { %1827 = vrcp.f32 %v791_v11 }
 0x44f   : > { %1829 = vrcp.f32 %v905_v7  ;;  %v1605_v7 = vld [vmem:[%s2289_s8] ss:$0 sm:$0xff] }
 0x450   : > { %1831 = vrcp.f32 %v1016_v10 }
 0x451   : > { %v910_v13 = vpop.permute.xlu1 %909 }
 0x452   : > { %v915_v15 = vsel %vm682_vm2, %v910_v13, 0  ;;  %v1810_v13 = vld [vmem:[%s2292_s11 + $0x8] sm:$0xff]  }
 0x455   : > { %v1021_v19 = vpop.permute.xlu1 %1020 }
 0x456   : > { %v1026_v20 = vsel %vm682_vm2, %v1021_v19, 0  ;;  %v1816_v19 = vld [vmem:[%s2292_s11 + $0x38] sm:$0xff]  }
 0x458   : > { %v1828_v12 = vpop.eup %1827 }
 0x459   : > { %v793_v14 = vmul.f32 %v1828_v12, %v1826_v4  ;;  %v1830_v17 = vpop.eup %1829  ;;  %v1809_v12 = vld [vmem:[%s2292_s11] sm:$0xff]  }
 0x45a   : > { %v907_v18 = vmul.f32 %v1830_v17, %v1822_v59  ;;  %v1832_v22 = vpop.eup %1831  ;;  %v1814_v17 = vld [vmem:[%s2292_s11 + $0x28] sm:$0xff]  }
 0x45b   : > { %v794_v16 = vpack.c.bf16 %v793_v14, %v793_v14  ;;  %v1018_v23 = vmul.f32 %v1832_v22, %v1824_v2  ;;  %v1811_v14 = vld [vmem:[%s2292_s11 + $0x10] sm:$0xff]  }
 0x45c   : > { %v908_v21 = vpack.c.bf16 %v907_v18, %v907_v18  ;;  %v1815_v18 = vld [vmem:[%s2292_s11 + $0x30] sm:$0xff]  }
 0x45d   : > { %1676 = vmatmul.mubr.msk.bf16.vlgmr.msra.gmra.mrb[12].mxu0 %vm619_vm1, %v794_v16  ;;  %v1019_v24 = vpack.c.bf16 %v1018_v23, %v1018_v23  ;;  %v1813_v16 = vld [vmem:[%s2292_s11 + $0x20] sm:$0xff]  }
 0x45e   : > { %1686 = vmatpush3.bf16.msra.mxu0 %v915_v15  ;;  %1687 = vmatprep.mubr.msk.bf16.mxu0 %vm1918_vm0, %v1917_v0  ;;  %v1812_v15 = vld [vmem:[%s2292_s11 + $0x18] sm:$0xff]  }
 0x45f   : > { %1697 = vmatprep.subr.bf16.mxu0 %v1917_v0 }
 0x465   : > { %1688 = vmatmul.mubr.msk.bf16.vlgmr.msra.gmra.mrb[16].mxu0 %vm619_vm1, %v908_v21 }
 0x466   : > { %1698 = vmatpush3.bf16.msra.mxu0 %v1026_v20  ;;  %1699 = vmatprep.mubr.msk.bf16.mxu0 %vm1918_vm0, %v1917_v0  ;;  %v1606_v20 = vld [vmem:[%s2291_s10] ss:$0 sm:$0xff] }
 0x467   : > { %1711 = vmatprep.subr.bf16.mxu0 %v1917_v0 }
 0x46d   : > { %1700 = vmatmul.mubr.msk.bf16.vlgmr.msra.gmra.mrb[20].mxu0 %vm619_vm1, %v1019_v24 }
 0x46e   : > { %1715 = vmatprep.mubr.msk.bf16.mxu0 %vm1918_vm0, %v1917_v0  ;;  %1712 = vmatpush3.bf16.msra.mxu0 %v1807_v62 }
 0x46f   : > { %1713 = vmatprep.subr.bf16.mxu0 %v1917_v0 }
 0x472   : > { %1714 = vmatpush3.bf16.msra.mxu0 %v1808_v63 }
 0x530   : > { %v840_v27 = vpop.f32.mrb[12].mxu0 }
 0x531   : > { %1069 = vrot.lane.b32.xlu0 %v840_v27, %s1922_s20  ;;  %v1677_v28 = vpop.f32.mrb[13].mxu0 }
 0x532   : > { %v843_v29 = vpop.f32.mrb[14].mxu0 }
 0x533   : > { %v1678_v30 = vpop.f32.mrb[15].mxu0 }
 0x538   : > { %v951_v31 = vpop.f32.mrb[16].mxu0 }
 0x539   : > { %1073 = vrot.lane.b32.xlu1 %v951_v31, %s1923_s22  ;;  %v1689_v32 = vpop.f32.mrb[17].mxu0  ;;  %s581_s22 = scalar_lea.vmem %s2309_s0, %s1584_s28 }
 0x53a   : > { %v954_v33 = vpop.f32.mrb[18].mxu0  ;;  %v615_v51 = vld [vmem:[%s581_s22] sm:$0xff] }
 0x53b   : > { %v1690_v34 = vpop.f32.mrb[19].mxu0 }
 0x540   : > { %v1062_v35 = vpop.f32.mrb[20].mxu0 }
 0x541   : > { %1077 = vrot.lane.b32.xlu0 %v1062_v35, %s1924_s24  ;;  %v1701_v37 = vpop.f32.mrb[21].mxu0  ;;  %v1274_v35 = vld [vmem:[#allocation4] sm:$0xff]  ;;  %s572_s24 = sand.u32 1, %s1899_s30  }
 0x542   : > { %v1065_v38 = vpop.f32.mrb[22].mxu0  ;;  %s1583_s1 = sshll.u32 %s572_s24, 3  ;;  %s1406_s27 = scalar_lea.sflag [#allocation6], %s572_s24 }
 0x543   : > { %v1702_v39 = vpop.f32.mrb[23].mxu0  ;;  %s574_s20 = scalar_lea.vmem [#allocation5], %s1583_s1  ;;  %s1841_s1 = sshll.u32 %s1925_s16, 4  ;;  %s1842_s1 = int_to_ptr.vmem [resolvable:$false] %s1841_s1 }
 0x544   : > { %s1420_s22 = sshll.u32 %s574_s20, 4  ;;  %s1843_s19 = scalar_lea.vmem %s1842_s1, 256  ;;  %s2235_s22 = int_to_ptr.vmem [resolvable:$true] %s1420_s22 }
 0x545   : > { %s1837_s28 = scalar_lea.vmem %s2235_s22, 128  ;;  %p1844_p1 = scmp.lt.s32.totalorder %s2235_s22, %s1842_s1 }
 0x546   : > { %p1838_p12 = scmp.ne.s32.totalorder %s2235_s22, %s1837_s28  ;;  %p1845_p2 = scmp.lt.s32.totalorder %s1843_s19, %s1837_s28 }
 0x548   : > { %p1839_p13 = pnand %p1838_p12, %p2041_p4  ;;  %p1846_p3 = por %p1845_p2, %p1844_p1 }
 0x54a   : > { %p1840_p0 = pneg %p1839_p13 }
 0x54c   : > { %p1847_p5 = pnand %p1846_p3, %p1840_p0 }
 0x5a3   : > { %v1070_v40 = vpop.permute.xlu0 %1069 }
 0x5a4   : > { %v1080_v42 = vsel %vm619_vm1, %v2117_v36, %v1070_v40  ;;  %v1603_v36 = vld [vmem:[%s2287_s6] ss:$0 sm:$0xff] }
 0x5ab   : > { %v1074_v41 = vpop.permute.xlu1 %1073 }
 0x5ac   : > { %v1082_v43 = vsel %vm1081_vm4, %v1080_v42, %v1074_v41  ;;  %v1618_v42 = vld [vmem:[%s2293_s12] ss:$0 sm:$0xff] }
 0x5b3   : > { %v1078_v44 = vpop.permute.xlu0 %1077 }
 0x5b4   : > { %v1084_v45 = vsel %vm1083_vm5, %v1082_v43, %v1078_v44  ;;  %v1619_v44 = vld [vmem:[%s2294_s13] ss:$0 sm:$0xff] }
 0x5b5   : > { %v1085_v46 = vpack.c.bf16 %v1084_v45, %v1084_v45 }
 0x5b7   : > { %1708 = vmatmul.mubr.msk.bf16.vlgmr.msra.gmra.mrb[8].mxu1 %vm1109_vm3, %v1085_v46 }
 0x5b8   : > { %1735 = vmatprep.mubr.msk.bf16.mxu1 %vm1918_vm0, %v1917_v0  ;;  %1720 = vmatpush3.bf16.msra.mxu1 %v1809_v12 }
 0x5b9   : > { %1721 = vmatprep.subr.bf16.mxu1 %v1917_v0 }
 0x5bc   : > { %1722 = vmatpush3.bf16.msra.mxu1 %v1810_v13 }
 0x5bd   : > { %1723 = vmatprep.subr.bf16.mxu1 %v1917_v0 }
 0x5c0   : > { %1724 = vmatpush3.bf16.msra.mxu1 %v1811_v14 }
 0x5c1   : > { %1725 = vmatprep.subr.bf16.mxu1 %v1917_v0 }
 0x5c4   : > { %1726 = vmatpush3.bf16.msra.mxu1 %v1812_v15 }
 0x5c5   : > { %1727 = vmatprep.subr.bf16.mxu1 %v1917_v0 }
 0x5c8   : > { %1728 = vmatpush3.bf16.msra.mxu1 %v1813_v16 }
 0x5c9   : > { %1729 = vmatprep.subr.bf16.mxu1 %v1917_v0 }
 0x5cc   : > { %1730 = vmatpush3.bf16.msra.mxu1 %v1814_v17 }
 0x5cd   : > { %1731 = vmatprep.subr.bf16.mxu1 %v1917_v0 }
 0x5d0   : > { %1732 = vmatpush3.bf16.msra.mxu1 %v1815_v18 }
 0x5d1   : > { %1733 = vmatprep.subr.bf16.mxu1 %v1917_v0 }
 0x5d4   : > { %1734 = vmatpush3.bf16.msra.mxu1 %v1816_v19 }
 0x68a   : > { %v1147_v48 = vpop.f32.mrb[8].mxu1 }
 0x68b   : > { %v1148_v49 = vadd.f32 %v1599_v47, %v1147_v48  ;;  %v1709_v50 = vpop.f32.mrb[9].mxu1 }
 0x68c   : > { %v1150_v52 = vpop.f32.mrb[10].mxu1 }
 0x68d   : > { %v1160_v53 = vmul.f32 %v1603_v36, %v1148_v49  ;;  %v1710_v54 = vpop.f32.mrb[11].mxu1 }
 0x68f   : > { %v1161_v55 = vadd.f32 %v1160_v53, %v615_v51 }
 0x691   : > { %1162 = vst.msk [vmem:[#allocation2] sm:$0xff] %vm1109_vm3, %v1161_v55  ;;  %v1163_v56 = vsel %vm1109_vm3, %v1161_v55, 0.0 }
 0x692   : > { %1164 = vadd.xlane.f32.xlu1 %v1163_v56 }
 0x698   : > { %v1385_v47 = vld [vmem:[#allocation2] sm:$0xff] }
 0x71f   : > { %v1165_v57 = vpop.xlane.xlu1 %1164 }
 0x720   : > { %v1167_v58 = vmul.f32 0.03125, %v1165_v57 }
 0x722   : > { %v1168_v59 = vsub.f32 %v1161_v55, %v1167_v58 }
 0x724   : > { %v1169_v60 = vmul.f32 %v1168_v59, %v1168_v59 }
 0x726   : > { %v1170_v61 = vsel %vm1109_vm3, %v1169_v60, 0.0 }
 0x727   : > { %1171 = vadd.xlane.f32.xlu0 %v1170_v61 }
 0x7b4   : > { %v1172_v1 = vpop.xlane.xlu0 %1171 }
 0x7b5   : > { %v1173_v2 = vmul.f32 0.03125, %v1172_v1 }
 0x7b7   : > { %v1174_v3 = vadd.f32 1e-06, %v1173_v2 }
 0x7b9   : > { %1833 = vrsqrt.f32 %v1174_v3 }
 0x7c3   : > { %v1834_v4 = vpop.eup %1833 }
 0x7c4   : > { %v1176_v6 = vmul.f32 %v1834_v4, %v1168_v59 }
 0x7c6   : > { %v1184_v8 = vmul.f32 %v1604_v5, %v1176_v6 }
 0x7c8   : > { %v1192_v9 = vadd.f32 %v1605_v7, %v1184_v8 }
 0x7ca   : > { %v1193_v10 = vpack.c.bf16 %v1192_v9, %v1192_v9 }
 0x7cc   : > { %1195 = vst.msk [vmem:[#allocation3] sm:$0xf] %vm1194_vm6, %v1193_v10 }
 0x7d3   : > { %v1197_v11 = vld [vmem:[#allocation3] sm:$0xf] }
 0x7d4   : > { %1716 = vmatmul.mubr.msk.bf16.vlgmr.msra.gmra.mrb[24].mxu0 %vm1109_vm3, %v1197_v11 }
 0x8a7   : > { %v1259_v21 = vpop.f32.mrb[24].mxu0 }
 0x8a8   : > { %v1260_v22 = vadd.f32 %v1606_v20, %v1259_v21  ;;  %v1717_v23 = vpop.f32.mrb[25].mxu0 }
 0x8a9   : > { %v1262_v24 = vpop.f32.mrb[26].mxu0 }
 0x8aa   : > { %v1265_v25 = vmul.f32 %v1260_v22, %v1260_v22  ;;  %v1718_v26 = vpop.f32.mrb[27].mxu0 }
 0x8ac   : > { %v1266_v27 = vmul.f32 %v1265_v25, %v1260_v22 }
 0x8ae   : > { %v1267_v28 = vmul.f32 0.044715, %v1266_v27 }
 0x8b0   : > { %v1268_v29 = vadd.f32 %v1267_v28, %v1260_v22 }
 0x8b2   : > { %v1269_v30 = vmul.f32 0.7978846, %v1268_v29 }
 0x8b4   : > { %1835 = vtanh.f32 %v1269_v30 }
 0x8be   : > { %v1836_v31 = vpop.eup %1835 }
 0x8bf   : > { %v1271_v32 = vadd.f32 1.0, %v1836_v31 }
 0x8c1   : > { %v1272_v0 = vmul.f32 0.5, %v1271_v32 }
 0x8c3   : > { %v1273_v33 = vmul.f32 %v1272_v0, %v1260_v22 }
 0x8c5   : > { %v1275_v34 = vpack.c.bf16 %v1273_v33, %v1273_v33 }
 0x8c7   : > { %1736 = vmatmul.mubr.bf16.vlgmr.msra.gmra.mrb[12].mxu1 %v1275_v34 }
 0x99a   : > { %v1374_v37 = vpop.f32.mrb[12].mxu1 }
 0x99b   : > { %v1380_v38 = vadd.f32 %v1374_v37, %v1274_v35  ;;  %v1737_v39 = vpop.f32.mrb[13].mxu1 }
 0x99c   : > { %v1377_v40 = vpop.f32.mrb[14].mxu1 }
 0x99d   : > { %1381 = vst.msk [vmem:[#allocation4] sm:$0xff] %vm1109_vm3, %v1380_v38  ;;  %v1738_v41 = vpop.f32.mrb[15].mxu1 }
 0x9a4   : > { %v1386_v43 = vld [vmem:[#allocation4] sm:$0xff] }
 0x9a5   : > { %v1394_v45 = vadd.f32 %v1618_v42, %v1386_v43 }
 0x9a7   : > { %v1402_v46 = vmul.f32 %v1619_v44, %v1394_v45 }
 0x9a9   : > { %v1403_v48 = vadd.f32 %v1402_v46, %v1385_v47 }
 0x9ab   : > { %1404 = vst.msk [vmem:[%s574_s20] sm:$0xff] %vm1109_vm3, %v1403_v48 }
 0x9ac   : > { %1850 = shalt.err (!%p1847_p5)
}
 0x9ad   : > { %s1851_s0 = scalar_lea.hbm %s2233_s3, 128  ;;  %s1855_s17 = scalar_lea.hbm %s2295_s14, 256 }
 0x9ae   : > { %p1852_p6 = scmp.ne.s32.totalorder %s2233_s3, %s1851_s0  ;;  %p1856_p10 = scmp.lt.u32.totalorder %s2233_s3, %s2295_s14 }
 0x9af   : > { %p1857_p11 = scmp.lt.u32.totalorder %s1855_s17, %s1851_s0  ;;  %p1859_p13 = scmp.lt.u32.totalorder %s1851_s0, %s2233_s3 }
 0x9b0   : > { %p1853_p7 = pnand %p1852_p6, %p2041_p4 }
 0x9b1   : > { %p1858_p12 = por %p1857_p11, %p1856_p10 }
 0x9b2   : > { %p1854_p9 = pneg %p1853_p7 }
 0x9b3   : > { %p1860_p0 = por %p1859_p13, %p1858_p12 }
 0x9b5   : > { %p1861_p1 = pnand %p1860_p0, %p1854_p9 }
 0x9b7   : > { %1864 = shalt.err (!%p1861_p1)
}
 0x9b8   : > { %1739 = dma.vmem_to_hbm [thread:$0]  (%p2041_p4), %s2235_s22, 128, %s2233_s3, %s1406_s27  }
 0x9b9 PF: > { %p1745_p2 = scmp.ge.s32.totalorder %s1915_s18, 2  ;;  %s1432_s28 = sand.u32 1, %s1895_s29  }
 0x9ba   : > { %s1433_s16 = scalar_lea.sflag [#allocation6], %s1432_s28 }
 0x9bb   : > { %p1742_p3 = pnand %p1745_p2, %p2048_p8 }
 0x9bd   : > { %1890 = dma.done.wait (!%p1742_p3), %s1433_s16, 128  }
 0x9be   : > { %1892 = vsyncadd (!%p1742_p3), %s1433_s16, 4294967168  ;;  %s27_s18 = sadd.s32 1, %s1915_s18   ;;  %s2310_s16 = sld [smem:[#allocation8_spill]] }
 0x9bf   : > { %p24_p5 = scmp.ge.s32.totalorder %s27_s18, 4   ;;  %s2311_s17 = sld [smem:[#allocation9_spill]] }
 0x9c0   : > { %s2312_s29 = smov %s1899_s30  ;;  %s2313_s30 = smov %s1903_s15 }
 0x9c1   : > { %s2314_s15 = smov %s2054_s26  ;;  %26 = sbr.rel (!%p24_p5) target bundleno = 9 (0x9), region = 137 }
 0x9c8   :  { %1438 = vsyncpa [#allocation6], 1 }
 0x9c9   :  { %1440 = vsyncpa [#allocation6 + $0x1], 1 }

</bundles_post_ra>
